<compile_context>
chip_gen: v7x
topology: tpu7x:2x2x1
jax: 0.10.0
libtpu: 0.0.40
codegen_flags: <defaults>
</compile_context>

<pallas_src>
import jax
import jax.numpy as jnp
from jax.experimental import pallas as pl
from jax.experimental.pallas import tpu as pltpu

# ----------------------------- config (small synthetic shapes) ---------------
B = 2          # batch (number of prompts)
L = 8          # sequence length (context length)
D = 32         # transformer width
H = 4          # attention heads
NUM_LAYERS = 2
P = 32         # text_projection output dim
EPS = 1e-5

# MXU operand dtype.  bf16 on all of v5e/v6e/v7x (no native f32 MXU path); f32
# accumulation is kept via preferred_element_type, LN/softmax stats stay f32.
MXU_DTYPE = jnp.bfloat16

# Number of prompt-level row tiles (leading "parallel" grid axis).  Set to 2 on v7x
# (2 TensorCores per chip) to use both cores at the cost of re-streaming layer
# weights; keep 1 on v5e/v6e (single TC).
ROW_TILES = 1

# MLP hidden is materialized at most [MLP_CHUNK_ROWS, 4D] at a time.
MLP_CHUNK_ROWS = 256

# Explicit scoped-VMEM budget: comfortably within v7x's 64 MiB physical VMEM and
# raises v5e's 16 MiB scoped default.
VMEM_LIMIT_BYTES = 32 * 1024 * 1024

# TODO(synk): at real CLIP width (D=512) the lane dim is already dense; for this
# D=32 synthetic config we do not pad D/P to 128 (would change LayerNorm semantics).


# ----------------------------- shared in-kernel helpers ----------------------
def _layernorm(x, g, b):
    # f32 statistics (v5e has no bf16 VPU); g/b are [1, width] and broadcast.
    mu = jnp.mean(x, axis=-1, keepdims=True)
    var = jnp.mean((x - mu) ** 2, axis=-1, keepdims=True)
    return (x - mu) * jax.lax.rsqrt(var + EPS) * g + b


def _matmul(x, w):
    # y = x @ w with w pre-transposed host-side to [in, out]: the contraction sits on
    # the weight's sublane axis, so no in-kernel relayout before the MXU push.
    # Operands cast to MXU_DTYPE (bf16), accumulation stays f32.
    return jnp.dot(x.astype(MXU_DTYPE), w.astype(MXU_DTYPE),
                   preferred_element_type=jnp.float32)


# ----------------------------- fused transformer kernel (all layers) ---------
def make_transformer_kernel(batch, seq, d_model, n_heads, mlp_chunk_rows):
    d_head = d_model // n_heads
    scale = 1.0 / (d_head ** 0.5)
    rows = batch * seq
    assert rows % mlp_chunk_rows == 0
    n_mlp_chunks = rows // mlp_chunk_rows

    def kernel(x_ref, mask_ref, vec_ref, wqkv_ref, wo_ref, wfc_ref, wpr_ref, out_ref):
        # Carried activation = output block (same block index every layer -> stays
        # resident in VMEM, written back to HBM once per row tile after the last
        # layer).  x_ref is aliased to out_ref in HBM and only read at layer 0.
        @pl.when(pl.program_id(1) == 0)
        def _init():
            out_ref[...] = x_ref[...]

        x = out_ref[...]                                    # [rows, D] f32

        # Packed per-layer vectors: [8, 4D] f32 (one DMA instead of eight).
        vecs = vec_ref[0]
        ln1g = vecs[0:1, :d_model]
        ln1b = vecs[1:2, :d_model]
        bqkv = vecs[2:3, :3 * d_model]
        bo   = vecs[3:4, :d_model]
        ln2g = vecs[4:5, :d_model]
        ln2b = vecs[5:6, :d_model]
        bfc  = vecs[6:7, :]
        bpr  = vecs[7:8, :d_model]

        # ---- ln_1 + fused QKV projection: one MXU pass with N = 3D ----
        xn = _layernorm(x, ln1g, ln1b)
        qkv = _matmul(xn, wqkv_ref[0]) + bqkv               # [rows, 3D] f32

        # ---- causal multi-head self-attention, all (head, batch) pairs batched ----
        # Head plumbing: one leading-dim reshape + H lane-slices + one concat per
        # tensor (op count independent of batch; no per-(b,h) stacks).
        qkv3 = qkv.reshape(batch, seq, 3 * d_model)         # split leading dim only

        def split_heads(col0):                              # -> [H*B, L, Dh]
            return jnp.concatenate(
                [qkv3[:, :, col0 + h * d_head: col0 + (h + 1) * d_head]
                 for h in range(n_heads)], axis=0)

        qh = split_heads(0)
        kh = split_heads(d_model)
        vh = split_heads(2 * d_model)

        s = jnp.einsum('bqd,bkd->bqk', qh.astype(MXU_DTYPE), kh.astype(MXU_DTYPE),
                       preferred_element_type=jnp.float32) * scale      # [H*B, L, L]
        s = s + mask_ref[...][None, :, :]                   # resident causal mask
        s = s - jnp.max(s, axis=-1, keepdims=True)
        p = jnp.exp(s)
        # Exact reciprocal: the EUP slot is not the bottleneck and approx error would
        # compound over layers at real CLIP depth.
        p = p * pl.reciprocal(jnp.sum(p, axis=-1, keepdims=True))
        ctx = jnp.einsum('bqk,bkd->bqd', p.astype(MXU_DTYPE), vh.astype(MXU_DTYPE),
                         preferred_element_type=jnp.float32)            # [H*B, L, Dh]

        # merge heads back to [B*L, D]: H leading slices + 1 lane-concat + 1 reshape
        ctx3 = jnp.concatenate(
            [ctx[h * batch:(h + 1) * batch] for h in range(n_heads)], axis=-1)
        ctx2 = ctx3.reshape(rows, d_model)

        x = x + _matmul(ctx2, wo_ref[0]) + bo
        out_ref[...] = x                                    # attention residual

        # ---- ln_2 + MLP (QuickGELU), row-chunked so the [chunk, 4D] hidden is the
        # only large temporary (reads/writes the carried out_ref in place) ----
        for c in range(n_mlp_chunks):
            sl = pl.ds(c * mlp_chunk_rows, mlp_chunk_rows)
            xc = out_ref[sl, :]
            xn2 = _layernorm(xc, ln2g, ln2b)
            hdn = _matmul(xn2, wfc_ref[0]) + bfc
            hdn = hdn * jax.nn.sigmoid(1.702 * hdn)          # QuickGELU
            out_ref[sl, :] = xc + _matmul(hdn, wpr_ref[0]) + bpr

    return kernel


def stack_block_params(blocks):
    """Stack per-layer weights along a leading layer axis.

    Big matrices: pre-transposed to [in, out] and stored in MXU_DTYPE (bf16) to halve
    HBM DMA / VMEM.  Small LN/bias vectors: packed into one f32 [layers, 8, 4D]
    tensor (row order: ln1g, ln1b, bqkv, bo, ln2g, ln2b, bfc, bpr, zero-padded).
    """
    w4 = 4 * D

    def pad(v):
        return jnp.pad(v, ((0, 0), (0, w4 - v.shape[1])))

    return {
        "wqkv": jnp.stack([bp["wqkv"].T for bp in blocks]).astype(MXU_DTYPE),  # [Ly,D,3D]
        "wo":   jnp.stack([bp["wo"].T for bp in blocks]).astype(MXU_DTYPE),    # [Ly,D,D]
        "wfc":  jnp.stack([bp["wfc"].T for bp in blocks]).astype(MXU_DTYPE),   # [Ly,D,4D]
        "wpr":  jnp.stack([bp["wpr"].T for bp in blocks]).astype(MXU_DTYPE),   # [Ly,4D,D]
        "vecs": jnp.stack([
            jnp.concatenate([pad(bp["ln1g"]), pad(bp["ln1b"]),
                             pad(bp["bqkv"]), pad(bp["bo"]),
                             pad(bp["ln2g"]), pad(bp["ln2b"]),
                             pad(bp["bfc"]), pad(bp["bpr"])], axis=0)
            for bp in blocks]),                                                # [Ly,8,4D] f32
    }


def run_transformer(x2d, stacked, mask):
    rows, width = x2d.shape
    num_layers = stacked["wqkv"].shape[0]
    assert B % ROW_TILES == 0 and rows % ROW_TILES == 0
    batch_per_tile = B // ROW_TILES
    tile_rows = rows // ROW_TILES
    mlp_chunk = MLP_CHUNK_ROWS if tile_rows % MLP_CHUNK_ROWS == 0 else tile_rows

    kernel = make_transformer_kernel(batch_per_tile, L, width, H, mlp_chunk)

    def weight_spec(a):
        blk = (1,) + a.shape[1:]
        return pl.BlockSpec(blk, lambda t, l, _n=a.ndim: (l,) + (0,) * (_n - 1))

    in_specs = [
        pl.BlockSpec((tile_rows, width), lambda t, l: (t, 0)),   # x (read at layer 0)
        pl.BlockSpec((L, L), lambda t, l: (0, 0)),               # resident causal mask
        weight_spec(stacked["vecs"]),
        weight_spec(stacked["wqkv"]),
        weight_spec(stacked["wo"]),
        weight_spec(stacked["wfc"]),
        weight_spec(stacked["wpr"]),
    ]

    return pl.pallas_call(
        kernel,
        out_shape=jax.ShapeDtypeStruct((rows, width), jnp.float32),
        grid=(ROW_TILES, num_layers),
        in_specs=in_specs,
        out_specs=pl.BlockSpec((tile_rows, width), lambda t, l: (t, 0)),
        input_output_aliases={0: 0},   # x2d HBM buffer reused as the output buffer
        compiler_params=pltpu.CompilerParams(
            dimension_semantics=("parallel", "arbitrary"),
            vmem_limit_bytes=VMEM_LIMIT_BYTES),
    )(x2d, mask, stacked["vecs"], stacked["wqkv"], stacked["wo"],
      stacked["wfc"], stacked["wpr"])


# ----------------------------- final EOS gather + ln_final + projection ------
def make_final_kernel():
    def kernel(eos_ref, x_ref, lng, lnb, proj, out_ref):
        rn = _layernorm(x_ref[...], lng[...], lnb[...])       # [1, D]
        out_ref[...] = jnp.dot(rn.astype(MXU_DTYPE), proj[...].astype(MXU_DTYPE),
                               preferred_element_type=jnp.float32)
    return kernel


def run_final(x2d, eos_idx, lnfg, lnfb, proj):
    rows, width = x2d.shape
    proj_dim = proj.shape[1]
    # TODO(synk): at large B, gather k EOS rows per grid step to amortize the ~0.35us
    # per-step overhead; at B=2 this is noise.
    grid_spec = pltpu.PrefetchScalarGridSpec(
        num_scalar_prefetch=1,
        grid=(B,),
        in_specs=[
            # Only the EOS row of each prompt is DMA'd: the scalar-prefetched eos
            # index feeds directly into the index_map (no in-kernel masked gather).
            pl.BlockSpec((1, width), lambda b, eos: (b * L + eos[b], 0)),
            pl.BlockSpec((1, width), lambda b, eos: (0, 0)),
            pl.BlockSpec((1, width), lambda b, eos: (0, 0)),
            pl.BlockSpec((width, proj_dim), lambda b, eos: (0, 0)),
        ],
        out_specs=pl.BlockSpec((1, proj_dim), lambda b, eos: (b, 0)),
    )
    return pl.pallas_call(
        make_final_kernel(),
        out_shape=jax.ShapeDtypeStruct((B, proj_dim), jnp.float32),
        grid_spec=grid_spec,
        compiler_params=pltpu.CompilerParams(dimension_semantics=("parallel",)),
    )(eos_idx, x2d, lnfg, lnfb, proj)


# ----------------------------- full TextEncoder forward ----------------------
def text_encoder_forward(prompts, tokenized_prompts, params):
    # x = prompts + positional_embedding ; flatten to [B*L, D] (lane-dense matmul rows)
    x = (prompts + params["pos"][None, :, :]).reshape(B * L, D)
    stacked = stack_block_params(params["blocks"])
    x = run_transformer(x, stacked, params["mask"])           # [B*L, D]
    eos_idx = jnp.argmax(tokenized_prompts, axis=-1).astype(jnp.int32)
    return run_final(x, eos_idx, params["lnfg"], params["lnfb"], params["proj"])


# ----------------------------- pure-JAX reference (for validation) -----------
def reference_forward(prompts, tokenized_prompts, params):
    def ln(x, g, b):
        mu = jnp.mean(x, axis=-1, keepdims=True)
        var = jnp.mean((x - mu) ** 2, axis=-1, keepdims=True)
        return (x - mu) * jax.lax.rsqrt(var + EPS) * g + b

    x = prompts + params["pos"][None, :, :]
    mask = params["mask"]
    d_head = D // H
    scale = 1.0 / (d_head ** 0.5)
    for bp in params["blocks"]:
        xn = ln(x, bp["ln1g"], bp["ln1b"])
        qkv = jnp.einsum("bld,ed->ble", xn, bp["wqkv"]) + bp["bqkv"]
        q, k, v = qkv[..., :D], qkv[..., D:2 * D], qkv[..., 2 * D:]
        qh = q.reshape(B, L, H, d_head).transpose(0, 2, 1, 3)
        kh = k.reshape(B, L, H, d_head).transpose(0, 2, 1, 3)
        vh = v.reshape(B, L, H, d_head).transpose(0, 2, 1, 3)
        s = jnp.einsum("bhqd,bhkd->bhqk", qh, kh) * scale + mask
        p = jax.nn.softmax(s, axis=-1)
        o = jnp.einsum("bhqk,bhkd->bhqd", p, vh).transpose(0, 2, 1, 3).reshape(B, L, D)
        attn = jnp.einsum("bld,ed->ble", o, bp["wo"]) + bp["bo"]
        x = x + attn
        xn2 = ln(x, bp["ln2g"], bp["ln2b"])
        hdn = jnp.einsum("bld,ed->ble", xn2, bp["wfc"]) + bp["bfc"]
        hdn = hdn * jax.nn.sigmoid(1.702 * hdn)
        x = x + jnp.einsum("bld,ed->ble", hdn, bp["wpr"]) + bp["bpr"]
    eos_idx = jnp.argmax(tokenized_prompts, axis=-1)
    xg = x[jnp.arange(B), eos_idx]
    xg = ln(xg, params["lnfg"], params["lnfb"])
    return xg @ params["proj"]


# ----------------------------- deterministic parameter init ------------------
def init_params(key):
    keys = jax.random.split(key, 4 + NUM_LAYERS)
    params = {
        "pos": 0.01 * jax.random.normal(keys[0], (L, D), jnp.float32),
        "lnfg": 1.0 + 0.02 * jax.random.normal(keys[1], (1, D), jnp.float32),
        "lnfb": 0.02 * jax.random.normal(keys[2], (1, D), jnp.float32),
        "proj": 0.05 * jax.random.normal(keys[3], (D, P), jnp.float32),
        "mask": jnp.where(
            jnp.arange(L)[None, :] > jnp.arange(L)[:, None], -1e9, 0.0
        ).astype(jnp.float32),
        "blocks": [],
    }
    for i in range(NUM_LAYERS):
        ks = jax.random.split(keys[4 + i], 12)
        params["blocks"].append({
            "ln1g": 1.0 + 0.02 * jax.random.normal(ks[0], (1, D), jnp.float32),
            "ln1b": 0.02 * jax.random.normal(ks[1], (1, D), jnp.float32),
            "wqkv": 0.05 * jax.random.normal(ks[2], (3 * D, D), jnp.float32),
            "bqkv": 0.02 * jax.random.normal(ks[3], (1, 3 * D), jnp.float32),
            "wo": 0.05 * jax.random.normal(ks[4], (D, D), jnp.float32),
            "bo": 0.02 * jax.random.normal(ks[5], (1, D), jnp.float32),
            "ln2g": 1.0 + 0.02 * jax.random.normal(ks[6], (1, D), jnp.float32),
            "ln2b": 0.02 * jax.random.normal(ks[7], (1, D), jnp.float32),
            "wfc": 0.05 * jax.random.normal(ks[8], (4 * D, D), jnp.float32),
            "bfc": 0.02 * jax.random.normal(ks[9], (1, 4 * D), jnp.float32),
            "wpr": 0.05 * jax.random.normal(ks[10], (D, 4 * D), jnp.float32),
            "bpr": 0.02 * jax.random.normal(ks[11], (1, D), jnp.float32),
        })
    return params


# ----------------------------- main -------------------------------------------
if __name__ == "__main__":
    key = jax.random.PRNGKey(0)
    k_param, k_prompt, k_tok = jax.random.split(key, 3)

    params = init_params(k_param)
    prompts = 0.1 * jax.random.normal(k_prompt, (B, L, D), jnp.float32)
    tokenized_prompts = jax.random.randint(k_tok, (B, L), 0, 1000, jnp.int32)

    out = text_encoder_forward(prompts, tokenized_prompts, params)
    out = jax.block_until_ready(out)

    ref = jax.block_until_ready(reference_forward(prompts, tokenized_prompts, params))
    assert out.shape == (B, P), out.shape
    # Tolerance reflects bf16 MXU operands (f32 accumulation, f32 stats/residuals);
    # with MXU_DTYPE=f32 the kernel matches the reference to ~1e-5.
    tol = 2e-5 if MXU_DTYPE is jnp.float32 else 3e-2
    err = float(jnp.max(jnp.abs(out - ref)))
    assert jnp.allclose(out, ref, rtol=tol, atol=tol), err

    print("KERNEL_OK")
</pallas_src>

<mosaic_0001>
module attributes {stable_mosaic.version = 11 : i64} {
  func.func @kernel(%arg0: i32, %arg1: i32, %arg2: memref<16x32xf32, #tpu.memory_space<vmem>>, %arg3: memref<8x8xf32, #tpu.memory_space<vmem>>, %arg4: memref<1x8x128xf32, #tpu.memory_space<vmem>>, %arg5: memref<1x32x96xbf16, #tpu.memory_space<vmem>>, %arg6: memref<1x32x32xbf16, #tpu.memory_space<vmem>>, %arg7: memref<1x32x128xbf16, #tpu.memory_space<vmem>>, %arg8: memref<1x128x32xbf16, #tpu.memory_space<vmem>>, %arg9: memref<16x32xf32, #tpu.memory_space<vmem>>) attributes {dimension_semantics = [#tpu.dimension_semantics<parallel>, #tpu.dimension_semantics<arbitrary>], iteration_bounds = array<i64: 1, 2>, scalar_prefetch = 0 : i64, scratch_operands = 0 : i64, tpu.core_type = #tpu.core_type<tc>, window_params = [{transform_indices = @transform_0, window_bounds = array<i64: 16, 32>}, {pipeline_mode = #tpu.pipeline_mode<synchronous>, transform_indices = @transform_1, window_bounds = array<i64: 8, 8>}, {transform_indices = @transform_2, window_bounds = array<i64: 1, 8, 128>}, {transform_indices = @transform_3, window_bounds = array<i64: 1, 32, 96>}, {transform_indices = @transform_4, window_bounds = array<i64: 1, 32, 32>}, {transform_indices = @transform_5, window_bounds = array<i64: 1, 32, 128>}, {transform_indices = @transform_6, window_bounds = array<i64: 1, 128, 32>}, {transform_indices = @transform_7, window_bounds = array<i64: 16, 32>}]} {
    %c0_i32 = arith.constant 0 : i32
    %0 = arith.cmpi eq, %arg1, %c0_i32 : i32
    %1 = arith.extui %0 : i1 to i32
    %c0_i32_0 = arith.constant 0 : i32
    %2 = arith.cmpi ne, %1, %c0_i32_0 : i32
    scf.if %2 {
      %c0_45 = arith.constant 0 : index
      %c0_46 = arith.constant 0 : index
      %139 = vector.load %arg2[%c0_45, %c0_46] : memref<16x32xf32, #tpu.memory_space<vmem>>, vector<16x32xf32>
      %c0_47 = arith.constant 0 : index
      %c0_48 = arith.constant 0 : index
      %140 = vector.load %arg9[%c0_47, %c0_48] : memref<16x32xf32, #tpu.memory_space<vmem>>, vector<16x32xf32>
      tpu.vector_store %arg9[%c0_47, %c0_48], %139 {strides = array<i32>} : memref<16x32xf32, #tpu.memory_space<vmem>>, vector<16x32xf32>,
    } else {
    }
    %c0 = arith.constant 0 : index
    %c0_1 = arith.constant 0 : index
    %3 = vector.load %arg9[%c0, %c0_1] : memref<16x32xf32, #tpu.memory_space<vmem>>, vector<16x32xf32>
    %c0_2 = arith.constant 0 : index
    %c0_3 = arith.constant 0 : index
    %c0_4 = arith.constant 0 : index
    %4 = vector.load %arg4[%c0_2, %c0_3, %c0_4] : memref<1x8x128xf32, #tpu.memory_space<vmem>>, vector<1x8x128xf32>
    %5 = vector.shape_cast %4 : vector<1x8x128xf32> to vector<8x128xf32>
    %6 = vector.extract_strided_slice %5 {offsets = [0, 0], sizes = [1, 32], strides = [1, 1]} : vector<8x128xf32> to vector<1x32xf32>
    %7 = vector.extract_strided_slice %5 {offsets = [1, 0], sizes = [1, 32], strides = [1, 1]} : vector<8x128xf32> to vector<1x32xf32>
    %8 = vector.extract_strided_slice %5 {offsets = [2, 0], sizes = [1, 96], strides = [1, 1]} : vector<8x128xf32> to vector<1x96xf32>
    %9 = vector.extract_strided_slice %5 {offsets = [3, 0], sizes = [1, 32], strides = [1, 1]} : vector<8x128xf32> to vector<1x32xf32>
    %10 = vector.extract_strided_slice %5 {offsets = [4, 0], sizes = [1, 32], strides = [1, 1]} : vector<8x128xf32> to vector<1x32xf32>
    %11 = vector.extract_strided_slice %5 {offsets = [5, 0], sizes = [1, 32], strides = [1, 1]} : vector<8x128xf32> to vector<1x32xf32>
    %12 = vector.extract_strided_slice %5 {offsets = [6, 0], sizes = [1, 128], strides = [1, 1]} : vector<8x128xf32> to vector<1x128xf32>
    %13 = vector.extract_strided_slice %5 {offsets = [7, 0], sizes = [1, 32], strides = [1, 1]} : vector<8x128xf32> to vector<1x32xf32>
    %cst = arith.constant dense<0.000000e+00> : vector<16xf32>
    %14 = vector.multi_reduction <add>, %3, %cst [1] : vector<16x32xf32> to vector<16xf32>
    %15 = vector.shape_cast %14 : vector<16xf32> to vector<16x1xf32>
    %cst_5 = arith.constant 3.200000e+01 : f32
    %16 = vector.broadcast %cst_5 : f32 to vector<16x1xf32>
    %17 = arith.divf %15, %16 : vector<16x1xf32>
    %18 = vector.broadcast %17 : vector<16x1xf32> to vector<16x32xf32>
    %19 = arith.subf %3, %18 : vector<16x32xf32>
    %20 = arith.mulf %19, %19 : vector<16x32xf32>
    %cst_6 = arith.constant dense<0.000000e+00> : vector<16xf32>
    %21 = vector.multi_reduction <add>, %20, %cst_6 [1] : vector<16x32xf32> to vector<16xf32>
    %22 = vector.shape_cast %21 : vector<16xf32> to vector<16x1xf32>
    %cst_7 = arith.constant 3.200000e+01 : f32
    %23 = vector.broadcast %cst_7 : f32 to vector<16x1xf32>
    %24 = arith.divf %22, %23 : vector<16x1xf32>
    %25 = vector.broadcast %17 : vector<16x1xf32> to vector<16x32xf32>
    %26 = arith.subf %3, %25 : vector<16x32xf32>
    %cst_8 = arith.constant 9.99999974E-6 : f32
    %27 = vector.broadcast %cst_8 : f32 to vector<16x1xf32>
    %28 = arith.addf %24, %27 : vector<16x1xf32>
    %29 = math.rsqrt %28 : vector<16x1xf32>
    %30 = vector.broadcast %29 : vector<16x1xf32> to vector<16x32xf32>
    %31 = arith.mulf %26, %30 : vector<16x32xf32>
    %32 = vector.broadcast %6 : vector<1x32xf32> to vector<16x32xf32>
    %33 = arith.mulf %31, %32 : vector<16x32xf32>
    %34 = vector.broadcast %7 : vector<1x32xf32> to vector<16x32xf32>
    %35 = arith.addf %33, %34 : vector<16x32xf32>
    %c0_9 = arith.constant 0 : index
    %c0_10 = arith.constant 0 : index
    %c0_11 = arith.constant 0 : index
    %36 = vector.load %arg5[%c0_9, %c0_10, %c0_11] : memref<1x32x96xbf16, #tpu.memory_space<vmem>>, vector<1x32x96xbf16>
    %37 = vector.shape_cast %36 : vector<1x32x96xbf16> to vector<32x96xbf16>
    %38 = arith.truncf %35 : vector<16x32xf32> to vector<16x32xbf16>
    %cst_12 = arith.constant dense<0.000000e+00> : vector<16x96xf32>
    %39 = tpu.matmul %38, %37, %cst_12 {dimension_numbers = #tpu.dot_dimension_numbers<[1], [0], [0], [1], [0, 0, 1, 1], [], []>} : vector<16x32xbf16>, vector<32x96xbf16>, vector<16x96xf32> -> vector<16x96xf32>
    %40 = vector.broadcast %8 : vector<1x96xf32> to vector<16x96xf32>
    %41 = arith.addf %39, %40 : vector<16x96xf32>
    %42 = vector.shape_cast %41 : vector<16x96xf32> to vector<2x8x96xf32>
    %43 = vector.extract_strided_slice %42 {offsets = [0, 0, 0], sizes = [2, 8, 8], strides = [1, 1, 1]} : vector<2x8x96xf32> to vector<2x8x8xf32>
    %44 = vector.extract_strided_slice %42 {offsets = [0, 0, 8], sizes = [2, 8, 8], strides = [1, 1, 1]} : vector<2x8x96xf32> to vector<2x8x8xf32>
    %45 = vector.extract_strided_slice %42 {offsets = [0, 0, 16], sizes = [2, 8, 8], strides = [1, 1, 1]} : vector<2x8x96xf32> to vector<2x8x8xf32>
    %46 = vector.extract_strided_slice %42 {offsets = [0, 0, 24], sizes = [2, 8, 8], strides = [1, 1, 1]} : vector<2x8x96xf32> to vector<2x8x8xf32>
    %47 = tpu.concatenate %43, %44, %45, %46 in 0 : vector<2x8x8xf32>, vector<2x8x8xf32>, vector<2x8x8xf32>, vector<2x8x8xf32> -> vector<8x8x8xf32>
    %48 = vector.extract_strided_slice %42 {offsets = [0, 0, 32], sizes = [2, 8, 8], strides = [1, 1, 1]} : vector<2x8x96xf32> to vector<2x8x8xf32>
    %49 = vector.extract_strided_slice %42 {offsets = [0, 0, 40], sizes = [2, 8, 8], strides = [1, 1, 1]} : vector<2x8x96xf32> to vector<2x8x8xf32>
    %50 = vector.extract_strided_slice %42 {offsets = [0, 0, 48], sizes = [2, 8, 8], strides = [1, 1, 1]} : vector<2x8x96xf32> to vector<2x8x8xf32>
    %51 = vector.extract_strided_slice %42 {offsets = [0, 0, 56], sizes = [2, 8, 8], strides = [1, 1, 1]} : vector<2x8x96xf32> to vector<2x8x8xf32>
    %52 = tpu.concatenate %48, %49, %50, %51 in 0 : vector<2x8x8xf32>, vector<2x8x8xf32>, vector<2x8x8xf32>, vector<2x8x8xf32> -> vector<8x8x8xf32>
    %53 = vector.extract_strided_slice %42 {offsets = [0, 0, 64], sizes = [2, 8, 8], strides = [1, 1, 1]} : vector<2x8x96xf32> to vector<2x8x8xf32>
    %54 = vector.extract_strided_slice %42 {offsets = [0, 0, 72], sizes = [2, 8, 8], strides = [1, 1, 1]} : vector<2x8x96xf32> to vector<2x8x8xf32>
    %55 = vector.extract_strided_slice %42 {offsets = [0, 0, 80], sizes = [2, 8, 8], strides = [1, 1, 1]} : vector<2x8x96xf32> to vector<2x8x8xf32>
    %56 = vector.extract_strided_slice %42 {offsets = [0, 0, 88], sizes = [2, 8, 8], strides = [1, 1, 1]} : vector<2x8x96xf32> to vector<2x8x8xf32>
    %57 = tpu.concatenate %53, %54, %55, %56 in 0 : vector<2x8x8xf32>, vector<2x8x8xf32>, vector<2x8x8xf32>, vector<2x8x8xf32> -> vector<8x8x8xf32>
    %58 = arith.truncf %47 : vector<8x8x8xf32> to vector<8x8x8xbf16>
    %59 = arith.truncf %52 : vector<8x8x8xf32> to vector<8x8x8xbf16>
    "tpu.trace_start"() <{level = 10 : i32, message = "bqd,bkd->bqk"}> : () -> ()
    %cst_13 = arith.constant dense<0.000000e+00> : vector<8x8x8xf32>
    %60 = tpu.matmul %58, %59, %cst_13 {dimension_numbers = #tpu.dot_dimension_numbers<[2], [2], [1], [1], [0, 0, 0, 1, 1, 1], [0], [0]>} : vector<8x8x8xbf16>, vector<8x8x8xbf16>, vector<8x8x8xf32> -> vector<8x8x8xf32>
    "tpu.trace_stop"() : () -> ()
    %cst_14 = arith.constant 0.353553385 : f32
    %61 = vector.broadcast %cst_14 : f32 to vector<8x8x8xf32>
    %62 = arith.mulf %60, %61 : vector<8x8x8xf32>
    %c0_15 = arith.constant 0 : index
    %c0_16 = arith.constant 0 : index
    %63 = vector.load %arg3[%c0_15, %c0_16] : memref<8x8xf32, #tpu.memory_space<vmem>>, vector<8x8xf32>
    %64 = vector.shape_cast %63 : vector<8x8xf32> to vector<1x8x8xf32>
    %65 = vector.broadcast %64 : vector<1x8x8xf32> to vector<8x8x8xf32>
    %66 = arith.addf %62, %65 : vector<8x8x8xf32>
    %cst_17 = arith.constant dense<0xFF800000> : vector<8x8xf32>
    %67 = vector.multi_reduction <maximumf>, %66, %cst_17 [2] : vector<8x8x8xf32> to vector<8x8xf32>
    %68 = vector.shape_cast %67 : vector<8x8xf32> to vector<8x8x1xf32>
    %69 = vector.broadcast %68 : vector<8x8x1xf32> to vector<8x8x8xf32>
    %70 = arith.subf %66, %69 : vector<8x8x8xf32>
    %71 = math.exp %70 : vector<8x8x8xf32>
    %cst_18 = arith.constant dense<0.000000e+00> : vector<8x8xf32>
    %72 = vector.multi_reduction <add>, %71, %cst_18 [2] : vector<8x8x8xf32> to vector<8x8xf32>
    %73 = vector.shape_cast %72 : vector<8x8xf32> to vector<8x8x1xf32>
    %74 = tpu.reciprocal %73 : vector<8x8x1xf32> -> vector<8x8x1xf32>
    %75 = vector.broadcast %74 : vector<8x8x1xf32> to vector<8x8x8xf32>
    %76 = arith.mulf %71, %75 : vector<8x8x8xf32>
    %77 = arith.truncf %76 : vector<8x8x8xf32> to vector<8x8x8xbf16>
    %78 = arith.truncf %57 : vector<8x8x8xf32> to vector<8x8x8xbf16>
    "tpu.trace_start"() <{level = 10 : i32, message = "bqk,bkd->bqd"}> : () -> ()
    %cst_19 = arith.constant dense<0.000000e+00> : vector<8x8x8xf32>
    %79 = tpu.matmul %77, %78, %cst_19 {dimension_numbers = #tpu.dot_dimension_numbers<[2], [1], [1], [2], [0, 0, 0, 1, 1, 2], [0], [0]>} : vector<8x8x8xbf16>, vector<8x8x8xbf16>, vector<8x8x8xf32> -> vector<8x8x8xf32>
    "tpu.trace_stop"() : () -> ()
    %80 = vector.extract_strided_slice %79 {offsets = [0, 0, 0], sizes = [2, 8, 8], strides = [1, 1, 1]} : vector<8x8x8xf32> to vector<2x8x8xf32>
    %81 = vector.extract_strided_slice %79 {offsets = [2, 0, 0], sizes = [2, 8, 8], strides = [1, 1, 1]} : vector<8x8x8xf32> to vector<2x8x8xf32>
    %82 = vector.extract_strided_slice %79 {offsets = [4, 0, 0], sizes = [2, 8, 8], strides = [1, 1, 1]} : vector<8x8x8xf32> to vector<2x8x8xf32>
    %83 = vector.extract_strided_slice %79 {offsets = [6, 0, 0], sizes = [2, 8, 8], strides = [1, 1, 1]} : vector<8x8x8xf32> to vector<2x8x8xf32>
    %84 = tpu.concatenate %80, %81, %82, %83 in 2 : vector<2x8x8xf32>, vector<2x8x8xf32>, vector<2x8x8xf32>, vector<2x8x8xf32> -> vector<2x8x32xf32>
    %85 = vector.shape_cast %84 : vector<2x8x32xf32> to vector<16x32xf32>
    %c0_20 = arith.constant 0 : index
    %c0_21 = arith.constant 0 : index
    %c0_22 = arith.constant 0 : index
    %86 = vector.load %arg6[%c0_20, %c0_21, %c0_22] : memref<1x32x32xbf16, #tpu.memory_space<vmem>>, vector<1x32x32xbf16>
    %87 = vector.shape_cast %86 : vector<1x32x32xbf16> to vector<32x32xbf16>
    %88 = arith.truncf %85 : vector<16x32xf32> to vector<16x32xbf16>
    %cst_23 = arith.constant dense<0.000000e+00> : vector<16x32xf32>
    %89 = tpu.matmul %88, %87, %cst_23 {dimension_numbers = #tpu.dot_dimension_numbers<[1], [0], [0], [1], [0, 0, 1, 1], [], []>} : vector<16x32xbf16>, vector<32x32xbf16>, vector<16x32xf32> -> vector<16x32xf32>
    %90 = arith.addf %3, %89 : vector<16x32xf32>
    %91 = vector.broadcast %9 : vector<1x32xf32> to vector<16x32xf32>
    %92 = arith.addf %90, %91 : vector<16x32xf32>
    %c0_24 = arith.constant 0 : index
    %c0_25 = arith.constant 0 : index
    %93 = vector.load %arg9[%c0_24, %c0_25] : memref<16x32xf32, #tpu.memory_space<vmem>>, vector<16x32xf32>
    tpu.vector_store %arg9[%c0_24, %c0_25], %92 {strides = array<i32>} : memref<16x32xf32, #tpu.memory_space<vmem>>, vector<16x32xf32>,
    %c0_26 = arith.constant 0 : index
    %c0_27 = arith.constant 0 : index
    %94 = vector.load %arg9[%c0_26, %c0_27] : memref<16x32xf32, #tpu.memory_space<vmem>>, vector<16x32xf32>
    %cst_28 = arith.constant dense<0.000000e+00> : vector<16xf32>
    %95 = vector.multi_reduction <add>, %94, %cst_28 [1] : vector<16x32xf32> to vector<16xf32>
    %96 = vector.shape_cast %95 : vector<16xf32> to vector<16x1xf32>
    %cst_29 = arith.constant 3.200000e+01 : f32
    %97 = vector.broadcast %cst_29 : f32 to vector<16x1xf32>
    %98 = arith.divf %96, %97 : vector<16x1xf32>
    %99 = vector.broadcast %98 : vector<16x1xf32> to vector<16x32xf32>
    %100 = arith.subf %94, %99 : vector<16x32xf32>
    %101 = arith.mulf %100, %100 : vector<16x32xf32>
    %cst_30 = arith.constant dense<0.000000e+00> : vector<16xf32>
    %102 = vector.multi_reduction <add>, %101, %cst_30 [1] : vector<16x32xf32> to vector<16xf32>
    %103 = vector.shape_cast %102 : vector<16xf32> to vector<16x1xf32>
    %cst_31 = arith.constant 3.200000e+01 : f32
    %104 = vector.broadcast %cst_31 : f32 to vector<16x1xf32>
    %105 = arith.divf %103, %104 : vector<16x1xf32>
    %106 = vector.broadcast %98 : vector<16x1xf32> to vector<16x32xf32>
    %107 = arith.subf %94, %106 : vector<16x32xf32>
    %cst_32 = arith.constant 9.99999974E-6 : f32
    %108 = vector.broadcast %cst_32 : f32 to vector<16x1xf32>
    %109 = arith.addf %105, %108 : vector<16x1xf32>
    %110 = math.rsqrt %109 : vector<16x1xf32>
    %111 = vector.broadcast %110 : vector<16x1xf32> to vector<16x32xf32>
    %112 = arith.mulf %107, %111 : vector<16x32xf32>
    %113 = vector.broadcast %10 : vector<1x32xf32> to vector<16x32xf32>
    %114 = arith.mulf %112, %113 : vector<16x32xf32>
    %115 = vector.broadcast %11 : vector<1x32xf32> to vector<16x32xf32>
    %116 = arith.addf %114, %115 : vector<16x32xf32>
    %c0_33 = arith.constant 0 : index
    %c0_34 = arith.constant 0 : index
    %c0_35 = arith.constant 0 : index
    %117 = vector.load %arg7[%c0_33, %c0_34, %c0_35] : memref<1x32x128xbf16, #tpu.memory_space<vmem>>, vector<1x32x128xbf16>
    %118 = vector.shape_cast %117 : vector<1x32x128xbf16> to vector<32x128xbf16>
    %119 = arith.truncf %116 : vector<16x32xf32> to vector<16x32xbf16>
    %cst_36 = arith.constant dense<0.000000e+00> : vector<16x128xf32>
    %120 = tpu.matmul %119, %118, %cst_36 {dimension_numbers = #tpu.dot_dimension_numbers<[1], [0], [0], [1], [0, 0, 1, 1], [], []>} : vector<16x32xbf16>, vector<32x128xbf16>, vector<16x128xf32> -> vector<16x128xf32>
    %121 = vector.broadcast %12 : vector<1x128xf32> to vector<16x128xf32>
    %122 = arith.addf %120, %121 : vector<16x128xf32>
    %cst_37 = arith.constant 1.702000e+00 : f32
    %123 = vector.broadcast %cst_37 : f32 to vector<16x128xf32>
    %124 = arith.mulf %123, %122 : vector<16x128xf32>
    %125 = arith.negf %124 : vector<16x128xf32>
    %126 = math.exp %125 : vector<16x128xf32>
    %cst_38 = arith.constant 1.000000e+00 : f32
    %127 = vector.broadcast %cst_38 : f32 to vector<16x128xf32>
    %128 = arith.addf %127, %126 : vector<16x128xf32>
    %129 = arith.divf %127, %128 : vector<16x128xf32>
    %130 = arith.mulf %122, %129 : vector<16x128xf32>
    %c0_39 = arith.constant 0 : index
    %c0_40 = arith.constant 0 : index
    %c0_41 = arith.constant 0 : index
    %131 = vector.load %arg8[%c0_39, %c0_40, %c0_41] : memref<1x128x32xbf16, #tpu.memory_space<vmem>>, vector<1x128x32xbf16>
    %132 = vector.shape_cast %131 : vector<1x128x32xbf16> to vector<128x32xbf16>
    %133 = arith.truncf %130 : vector<16x128xf32> to vector<16x128xbf16>
    %cst_42 = arith.constant dense<0.000000e+00> : vector<16x32xf32>
    %134 = tpu.matmul %133, %132, %cst_42 {dimension_numbers = #tpu.dot_dimension_numbers<[1], [0], [0], [1], [0, 0, 1, 1], [], []>} : vector<16x128xbf16>, vector<128x32xbf16>, vector<16x32xf32> -> vector<16x32xf32>
    %135 = arith.addf %94, %134 : vector<16x32xf32>
    %136 = vector.broadcast %13 : vector<1x32xf32> to vector<16x32xf32>
    %137 = arith.addf %135, %136 : vector<16x32xf32>
    %c0_43 = arith.constant 0 : index
    %c0_44 = arith.constant 0 : index
    %138 = vector.load %arg9[%c0_43, %c0_44] : memref<16x32xf32, #tpu.memory_space<vmem>>, vector<16x32xf32>
    tpu.vector_store %arg9[%c0_43, %c0_44], %137 {strides = array<i32>} : memref<16x32xf32, #tpu.memory_space<vmem>>, vector<16x32xf32>,
    return
  }
  func.func @transform_0(%arg0: i32, %arg1: i32) -> (i32, i32) {
    %c0_i32 = arith.constant 0 : i32
    %c0_i32_0 = arith.constant 0 : i32
    return %arg0, %c0_i32 : i32, i32
  }
  func.func @transform_1(%arg0: i32, %arg1: i32) -> (i32, i32) {
    %c0_i32 = arith.constant 0 : i32
    %c0_i32_0 = arith.constant 0 : i32
    %c0_i32_1 = arith.constant 0 : i32
    return %c0_i32, %c0_i32_0 : i32, i32
  }
  func.func @transform_2(%arg0: i32, %arg1: i32) -> (i32, i32, i32) {
    %c0_i32 = arith.constant 0 : i32
    %c0_i32_0 = arith.constant 0 : i32
    %c0_i32_1 = arith.constant 0 : i32
    return %arg1, %c0_i32, %c0_i32_0 : i32, i32, i32
  }
  func.func @transform_3(%arg0: i32, %arg1: i32) -> (i32, i32, i32) {
    %c0_i32 = arith.constant 0 : i32
    %c0_i32_0 = arith.constant 0 : i32
    %c0_i32_1 = arith.constant 0 : i32
    return %arg1, %c0_i32, %c0_i32_0 : i32, i32, i32
  }
  func.func @transform_4(%arg0: i32, %arg1: i32) -> (i32, i32, i32) {
    %c0_i32 = arith.constant 0 : i32
    %c0_i32_0 = arith.constant 0 : i32
    %c0_i32_1 = arith.constant 0 : i32
    return %arg1, %c0_i32, %c0_i32_0 : i32, i32, i32
  }
  func.func @transform_5(%arg0: i32, %arg1: i32) -> (i32, i32, i32) {
    %c0_i32 = arith.constant 0 : i32
    %c0_i32_0 = arith.constant 0 : i32
    %c0_i32_1 = arith.constant 0 : i32
    return %arg1, %c0_i32, %c0_i32_0 : i32, i32, i32
  }
  func.func @transform_6(%arg0: i32, %arg1: i32) -> (i32, i32, i32) {
    %c0_i32 = arith.constant 0 : i32
    %c0_i32_0 = arith.constant 0 : i32
    %c0_i32_1 = arith.constant 0 : i32
    return %arg1, %c0_i32, %c0_i32_0 : i32, i32, i32
  }
  func.func @transform_7(%arg0: i32, %arg1: i32) -> (i32, i32) {
    %c0_i32 = arith.constant 0 : i32
    %c0_i32_0 = arith.constant 0 : i32
    return %arg0, %c0_i32 : i32, i32
  }
}

</mosaic_0001>

<bundles_post_ra>
// kernel: tpu_custom_call.1
= control target key start
LH: loop header
LB: loop body
LE: loop exit
PB: predicated region body
PF: predicated region fallthrough
CT: control target
= control target key end

     0   :  { %12 = vsyncpa [#allocation3], 0  ;;  %s2826_s0 = inlined_call_operand.hbm [shape: f32[16,32], index: 0, kind: input, shape index: {}, may-alias: {0,7}]   ;;  %s2827_s1 = inlined_call_operand.vmem [shape: f32[8,8], index: 1, kind: input, shape index: {}]   ;;  %s2828_s2 = inlined_call_operand.vmem [shape: f32[2,8,128], index: 2, kind: input, shape index: {}]   ;;  %s2829_s3 = inlined_call_operand.vmem [shape: bf16[2,32,96], index: 3, kind: input, shape index: {}]   ;;  %s2830_s4 = inlined_call_operand.vmem [shape: bf16[2,32,32], index: 4, kind: input, shape index: {}]   ;;  %s2831_s5 = inlined_call_operand.vmem [shape: bf16[2,32,128], index: 5, kind: input, shape index: {}]   ;;  %s2832_s6 = inlined_call_operand.vmem [shape: bf16[2,128,32], index: 6, kind: input, shape index: {}]   ;;  %s2833_s7 = inlined_call_operand.hbm [shape: f32[16,32], index: 7, kind: output, shape index: {}, may-alias: {0,7}]  }
   0x1   :  { %13 = vsyncpa [#allocation4], 0  ;;  %s2422_s24 = smov 0   ;;  %s2424_s25 = smov 0  }
   0x2   :  { %s2426_s26 = smov 0  }
   0x3 LB: > { %s1885_s27 = sadd.s32 4294967295, %s2365_s26   ;;  %s28_s28 = sadd.s32 1, %s2361_s25  ;;  %s2365_s26 = sphi %s2426_s26, %s19_s26   ;;  %s2361_s25 = sphi %s2424_s25, %s2844_s25   ;;  %s2357_s24 = sphi %s2422_s24, %s2843_s24  }
   0x4   : > { %p29_p0 = scmp.ge.s32.totalorder %s28_s28, 2  ;;  %p1886_p1 = scmp.ge.s32.totalorder %s2365_s26, 1 }
   0x5   : > { %p239_p2 = scmp.lt.s32.totalorder %s2365_s26, 3  ;;  %p2449_p4 = scmp.eq.s32.totalorder %s1885_s27, 0 }
   0x6   : > { %s2846_s28 = smov (%p29_p0, %s28_s28), 0  ;;  %s2367_s8 = smov [#allocation2]  }
   0x7   : > { %p2443_p3 = pnand %p1886_p1, %p239_p2  ;;  %s254_s9 = sshll.u32 %s2367_s8, 4  ;;  %s255_s9 = int_to_ptr.vmem [resolvable:$true] %s254_s9 }
   0x8   : > { %s2838_s30 = scalar_select %p2449_p4, 1, 0 }
   0x9   : > { %s2837_s29 = scalar_select %p2443_p3, 1, 0 }
   0xa   : > { %p2142_p5 = pneg %p2443_p3  ;;  %s2281_s13 = scalar_lea.hbm %s2826_s0, 256 }
   0xb   : > { %p2282_p7 = scmp.ne.s32.totalorder %s2826_s0, %s2281_s13  ;;  %p2288_p11 = scmp.lt.u32.totalorder %s2281_s13, %s2826_s0 }
   0xc   : > { %p2457_p6 = pnand %p2449_p4, %p2142_p5 }
   0xe   : > { %p2283_p8 = pneg %p2457_p6 }
  0x10   : > { %p2284_p9 = pnand %p2283_p8, %p2282_p7 }
  0x12   : > { %p2285_p10 = pneg %p2284_p9 }
  0x14   : > { %p2290_p12 = pnand %p2288_p11, %p2285_p10 }
  0x16   : > { %2293 = shalt.err (!%p2290_p12)
}
  0x17   : > { %s2294_s18 = scalar_lea.vmem %s255_s9, 256  ;;  %p2302_p2 = scmp.lt.s32.totalorder %s255_s9, %s255_s9 }
  0x18   : > { %p2295_p13 = scmp.ne.s32.totalorder %s255_s9, %s2294_s18  ;;  %p2303_p5 = scmp.lt.s32.totalorder %s2294_s18, %s2294_s18 }
  0x1a   : > { %p2297_p0 = pnand %p2295_p13, %p2283_p8  ;;  %p2304_p4 = por %p2303_p5, %p2302_p2 }
  0x1c   : > { %p2298_p1 = pneg %p2297_p0 }
  0x1e   : > { %p2305_p3 = pnand %p2304_p4, %p2298_p1 }
  0x20   : > { %2308 = shalt.err (!%p2305_p3)
}
  0x21   : > { %s2368_s19 = smov 128   ;;  %s2369_s20 = smov 8  }
  0x22   : > { %2145 = dma.hbm_to_vmem [thread:$0]  (!%p2457_p6), %s2826_s0, 256, %s255_s9, [#allocation3], %s2368_s19, %s2368_s19, %s2369_s20  }
  0x23   : > { %p2840_p7 = scmp.ne.s32.totalorder %s2837_s29, 0 }
  0x24   : > { %p2841_p9 = scmp.ne.s32.totalorder (!%p2840_p7), %s2838_s30, 0 }
  0x25   : > { %312 = sbr.rel (%p2840_p7) target bundleno = 2791 (0xae7), region = 48 }
  0x2c   : > { %2348 = dma.done.wait (%p2841_p9), [#allocation3], 256  }
  0x2d   : > { %2350 = vsyncadd (%p2841_p9), [#allocation3], 4294967040  ;;  %p359_p3 = scmp.lt.s32.totalorder %s2357_s24, 1  ;;  %p1900_p4 = scmp.ne.s32.totalorder %s2357_s24, 0 }
  0x2e   : > { %v389_v0 = vld [vmem:[#allocation2] sm:$0xff] (!%p1900_p4)  ;;  %vm391_vm0 = vcmask (!%p1900_p4), 261120   ;;  %v390_v1 = vld [vmem:[#allocation2 + $0x8] sm:$0xff] (!%p1900_p4) }
  0x2f   : > { %s360_s23 = scalar_select %p359_p3, %s2357_s24, 1 }
  0x30   : > { %388 = sbr.rel (%p1900_p4) target bundleno = 55 (0x37), region = 56  ;;  %392 = vst.msk [vmem:[#allocation5] sm:$0xff] (!%p1900_p4), %vm391_vm0, %v389_v0  ;;  %393 = vst.msk [vmem:[#allocation5 + $0x8] sm:$0xff] (!%p1900_p4), %vm391_vm0, %v390_v1 }
  0x31   : > { %s1891_s8 = sshll.u32 %s360_s23, 3  ;;  %s1940_s11 = sshll.u32 %s360_s23, 4 }
  0x32   : > { %s2488_s13 = scalar_lea.vmem %s2828_s2, %s1891_s8  ;;  %s2493_s14 = scalar_lea.vmem %s2829_s3, %s1940_s11 }
  0x33   : > { %s2498_s30 = scalar_lea.vmem %s2830_s4, %s1940_s11  ;;  %s2503_s19 = scalar_lea.vmem %s2831_s5, %s1940_s11 }
  0x34   : > { %s1943_s20 = sshll.u32 %s360_s23, 6 }
  0x35   : > { %s2508_s8 = scalar_lea.vmem %s2832_s6, %s1943_s20 }
  0x37 PF: > { %v2511_v2 = vld [vmem:[#allocation5] sm:$0xff]  ;;  %vm397_vm1 = vcmask 261120   ;;  %v2513_v3 = vld [vmem:[#allocation5 + $0x8] sm:$0xff]  ;;  %v2219_v16 = vld [vmem:[%s2493_s14] sm:$0xff]   ;;  %v2370_v17 = vmov 0.0   ;;  %vm2371_vm2 = vmmov 0   ;;  %v425_v23 = vlaneseq }
  0x38   : > { %v398_v4 = vsel %vm397_vm1, %v2511_v2, 0.0  ;;  %v401_v5 = vsel %vm397_vm1, %v2513_v3, 0.0  ;;  %1994 = vmatprep.subr.bf16.mxu0 %v2370_v17  ;;  %2014 = vmatprep.subr.bf16.mxu1 %v2370_v17  ;;  %v2220_v18 = vld [vmem:[%s2493_s14 + $0x8] sm:$0xff]   ;;  %v2537_v28 = vld [vmem:[%s2488_s13] sm:$0xff]  ;;  %s2372_s24 = smov 112   ;;  %s2373_s23 = smov 120  }
  0x39   : > { %399 = vadd.xlane.f32.xlu0 %v398_v4  ;;  %1995 = vmatpush3.bf16.msra.mxu0 %v2219_v16  ;;  %v2533_v26 = vshrl.u32 %v425_v23, 7  ;;  %s2374_s11 = smov 104   ;;  %s2375_s10 = smov 96   ;;  %vm533_vm3 = vcmask 64512   ;;  %vm1041_vm4 = vcmask 1043456   ;;  %vm1447_vm5 = vcmask 130048  }
  0x3a   : > { %1998 = vmatprep.mubr.msk.bf16.mxu0 %vm2371_vm2, %v2370_v17  ;;  %1996 = vmatprep.subr.bf16.mxu0 %v2370_v17  ;;  %s2376_s12 = smov 64   ;;  %s2377_s29 = smov 8   ;;  %vm1450_vm6 = vcmask 195584  }
  0x3b   : > { %2016 = vmatprep.mubr.msk.bf16.mxu1 %vm2371_vm2, %v2370_v17  ;;  %v427_v27 = vsub.s32 0, %v2533_v26  ;;  %v433_v32 = vsub.s32 1, %v2533_v26  ;;  %v444_v41 = vsub.s32 2, %v2533_v26  ;;  %s2378_s14 = smov 16   ;;  %s2379_s15 = smov 24  }
  0x3c   : > { %s2380_s16 = smov [#allocation5]   ;;  %p2788_p6 = scmp.eq.s32.totalorder %s1885_s27, 1 }
  0x3d   : > { %402 = vadd.xlane.f32.xlu0 %v401_v5  ;;  %1997 = vmatpush3.bf16.msra.mxu0 %v2220_v18  ;;  %v428_v31 = vrot.slane %v2537_v28, %v427_v27  ;;  %v434_v36 = vrot.slane %v2537_v28, %v433_v32  ;;  %v445_v42 = vrot.slane %v2537_v28, %v444_v41 }
  0x3e   : > { %2002 = vmatprep.subr.bf16.mxu0 %v2370_v17 }
  0xc6   : > { %v400_v6 = vpop.xlane.xlu0 %399 }
  0xc7   : > { %v405_v7 = vmul.f32 0.03125, %v400_v6 }
  0xc9   : > { %v407_v8 = vsub.f32 %v2511_v2, %v405_v7 }
  0xca   : > { %v403_v9 = vpop.xlane.xlu0 %402 }
  0xcb   : > { %v406_v10 = vmul.f32 0.03125, %v403_v9  ;;  %v409_v11 = vmul.f32 %v407_v8, %v407_v8 }
  0xcd   : > { %v408_v12 = vsub.f32 %v2513_v3, %v406_v10  ;;  %v411_v13 = vsel %vm397_vm1, %v409_v11, 0.0 }
  0xce   : > { %412 = vadd.xlane.f32.xlu1 %v411_v13 }
  0xcf   : > { %v410_v14 = vmul.f32 %v408_v12, %v408_v12 }
  0xd1   : > { %v414_v15 = vsel %vm397_vm1, %v410_v14, 0.0 }
  0xd2   : > { %415 = vadd.xlane.f32.xlu1 %v414_v15 }
 0x15b   : > { %v413_v19 = vpop.xlane.xlu1 %412 }
 0x15c   : > { %v417_v20 = vmul.f32 0.03125, %v413_v19 }
 0x15e   : > { %v419_v21 = vadd.f32 1e-05, %v417_v20 }
 0x15f   : > { %v416_v22 = vpop.xlane.xlu1 %415 }
 0x160   : > { %2233 = vrsqrt.f32 %v419_v21  ;;  %v418_v24 = vmul.f32 0.03125, %v416_v22 }
 0x162   : > { %v420_v25 = vadd.f32 1e-05, %v418_v24 }
 0x164   : > { %2235 = vrsqrt.f32 %v420_v25  ;;  %v931_v25 = vld [vmem:[%s2827_s1] sm:$0xff] }
 0x16a   : > { %v2234_v29 = vpop.eup %2233 }
 0x16b   : > { %v423_v30 = vmul.f32 %v2234_v29, %v407_v8 }
 0x16d   : > { %v429_v35 = vmul.f32 %v428_v31, %v423_v30 }
 0x16e   : > { %v2236_v33 = vpop.eup %2235 }
 0x16f   : > { %v424_v34 = vmul.f32 %v2236_v33, %v408_v12  ;;  %v435_v38 = vadd.f32 %v434_v36, %v429_v35 }
 0x171   : > { %v430_v37 = vmul.f32 %v428_v31, %v424_v34 }
 0x173   : > { %v436_v39 = vadd.f32 %v434_v36, %v430_v37 }
 0x175   : > { %v441_v40 = vpack.c.bf16 %v436_v39, %v435_v38 }
 0x177   : > { %1999 = vmatmul.mubr.msk.bf16.vlgmr.msra.gmra.mrb[0].mxu0 %vm397_vm1, %v441_v40 }
 0x178   : > { %2004 = vmatprep.mubr.msk.bf16.mxu0 %vm2371_vm2, %v2370_v17 }
 0x24a   : > { %v495_v43 = vpop.f32.mrb[0].mxu0 }
 0x24b   : > { %v2000_v44 = vpop.f32.mrb[1].mxu0  ;;  %v496_v46 = vadd.f32 %v495_v43, %v445_v42 }
 0x24c   : > { %v498_v45 = vpop.f32.mrb[2].mxu0 }
 0x24d   : > { %v499_v47 = vadd.f32 %v498_v45, %v445_v42  ;;  %v2001_v48 = vpop.f32.mrb[3].mxu0  ;;  %v522_v51 = vpack.c.bf16 %v496_v46, %v496_v46 }
 0x24f   : > { %v2194_v49 = vpack.i.bf16 %v499_v47, %v496_v46  ;;  %v2547_v50 = vpack.c.bf16 %v499_v47, %v499_v47 }
 0x251   : > { %2195 = vrot.lane.b32.xlu1 %v2194_v49, %s2372_s24  ;;  %2190 = vrot.lane.b32.xlu0 %v2194_v49, %s2373_s23 }
 0x255   : > { %2200 = vrot.lane.b32.xlu1 %v2194_v49, %s2374_s11  ;;  %581 = vrot.lane.b32.xlu0 %v2547_v50, %s2375_s10 }
 0x259   : > { %531 = vrot.lane.b32.xlu1 %v522_v51, %s2375_s10 }
 0x2c3   : > { %v2196_v52 = vpop.permute.xlu1 %2195  ;;  %v2191_v53 = vpop.permute.xlu0 %2190 }
 0x2c4   : > { %v2193_v54 = vunpack.i.h.bf16 %v2191_v53  ;;  %v2192_v55 = vunpack.i.l.bf16 %v2191_v53  ;;  %v2198_v56 = vunpack.i.h.bf16 %v2196_v52  ;;  %v2197_v57 = vunpack.i.l.bf16 %v2196_v52 }
 0x2c6   : > { %v2550_v58 = vpack.c.bf16 %v2193_v54, %v2193_v54  ;;  %v2552_v59 = vpack.c.bf16 %v2192_v55, %v2192_v55  ;;  %v2556_v61 = vpack.c.bf16 %v2198_v56, %v2198_v56  ;;  %v2558_v62 = vpack.c.bf16 %v2197_v57, %v2197_v57 }
 0x2c7   : > { %v2201_v60 = vpop.permute.xlu1 %2200  ;;  %v582_v7 = vpop.permute.xlu0 %581 }
 0x2c8   : > { %630 = vrot.lane.b32.xlu1 %v2552_v59, %s2375_s10  ;;  %679 = vrot.lane.b32.xlu0 %v2550_v58, %s2375_s10  ;;  %v2203_v63 = vunpack.i.h.bf16 %v2201_v60  ;;  %v2202_v0 = vunpack.i.l.bf16 %v2201_v60  ;;  %v587_v8 = vsel %vm533_vm3, %v582_v7, 0 }
 0x2ca   : > { %v2563_v5 = vpack.c.bf16 %v2203_v63, %v2203_v63  ;;  %v2565_v6 = vpack.c.bf16 %v2202_v0, %v2202_v0 }
 0x2cb   : > { %v532_v1 = vpop.permute.xlu1 %531 }
 0x2cc   : > { %v538_v4 = vsel %vm533_vm3, %v532_v1, 0  ;;  %728 = vrot.lane.b32.xlu1 %v2558_v62, %s2375_s10  ;;  %777 = vrot.lane.b32.xlu0 %v2556_v61, %s2375_s10 }
 0x2cd   : > { %2003 = vmatpush3.bf16.xpose.msra.mxu0 %v538_v4 }
 0x2ce   : > { %2008 = vmatprep.subr.bf16.mxu0 %v2370_v17 }
 0x2d0   : > { %826 = vrot.lane.b32.xlu1 %v2565_v6, %s2375_s10  ;;  %875 = vrot.lane.b32.xlu0 %v2563_v5, %s2375_s10 }
 0x2d4   : > { %2005 = vmatmul.mubr.msk.bf16.vlgmr.msra.gmra.mrb[4].mxu0 %vm533_vm3, %v522_v51  ;;  %1036 = vrot.lane.b32.xlu1 %v522_v51, %s2376_s12 }
 0x2d5   : > { %2009 = vmatpush3.bf16.xpose.msra.mxu0 %v587_v8  ;;  %2010 = vmatprep.mubr.msk.bf16.mxu0 %vm2371_vm2, %v2370_v17 }
 0x2d6   : > { %2020 = vmatprep.subr.bf16.mxu0 %v2370_v17 }
 0x2dc   : > { %2011 = vmatmul.mubr.msk.bf16.vlgmr.msra.gmra.mrb[8].mxu0 %vm533_vm3, %v2547_v50 }
 0x2dd   : > { %2022 = vmatprep.mubr.msk.bf16.mxu0 %vm2371_vm2, %v2370_v17 }
 0x33a   : > { %v631_v9 = vpop.permute.xlu1 %630  ;;  %v680_v10 = vpop.permute.xlu0 %679 }
 0x33b   : > { %v685_v11 = vsel %vm533_vm3, %v680_v10, 0  ;;  %v636_v12 = vsel %vm533_vm3, %v631_v9, 0 }
 0x33c   : > { %2015 = vmatpush3.bf16.xpose.msra.mxu1 %v636_v12  ;;  %2021 = vmatpush3.bf16.xpose.msra.mxu0 %v685_v11 }
 0x33d   : > { %2026 = vmatprep.subr.bf16.mxu1 %v2370_v17  ;;  %2032 = vmatprep.subr.bf16.mxu0 %v2370_v17 }
 0x33e   : > { %v729_v13 = vpop.permute.xlu1 %728  ;;  %v778_v14 = vpop.permute.xlu0 %777 }
 0x33f   : > { %v734_v15 = vsel %vm533_vm3, %v729_v13, 0  ;;  %v783_v16 = vsel %vm533_vm3, %v778_v14, 0 }
 0x342   : > { %v827_v18 = vpop.permute.xlu1 %826  ;;  %v876_v19 = vpop.permute.xlu0 %875 }
 0x343   : > { %2017 = vmatmul.mubr.msk.bf16.vlgmr.msra.gmra.mrb[0].mxu1 %vm533_vm3, %v2552_v59  ;;  %2023 = vmatmul.mubr.msk.bf16.vlgmr.msra.gmra.mrb[12].mxu0 %vm533_vm3, %v2550_v58  ;;  %v832_v20 = vsel %vm533_vm3, %v827_v18, 0  ;;  %v881_v21 = vsel %vm533_vm3, %v876_v19, 0 }
 0x344   : > { %2027 = vmatpush3.bf16.xpose.msra.mxu1 %v734_v15  ;;  %2033 = vmatpush3.bf16.xpose.msra.mxu0 %v783_v16 }
 0x345   : > { %2028 = vmatprep.mubr.msk.bf16.mxu1 %vm2371_vm2, %v2370_v17  ;;  %2034 = vmatprep.mubr.msk.bf16.mxu0 %vm2371_vm2, %v2370_v17 }
 0x346   : > { %2038 = vmatprep.subr.bf16.mxu1 %v2370_v17  ;;  %2044 = vmatprep.subr.bf16.mxu0 %v2370_v17  ;;  %v1037_v22 = vpop.permute.xlu1 %1036 }
 0x347   : > { %v1043_v23 = vsel %vm1041_vm4, %v1037_v22, 0 }
 0x34b   : > { %2029 = vmatmul.mubr.msk.bf16.vlgmr.msra.gmra.mrb[4].mxu1 %vm533_vm3, %v2558_v62  ;;  %2035 = vmatmul.mubr.msk.bf16.vlgmr.msra.gmra.mrb[16].mxu0 %vm533_vm3, %v2556_v61 }
 0x34c   : > { %2039 = vmatpush3.bf16.xpose.msra.mxu1 %v832_v20  ;;  %2045 = vmatpush3.bf16.xpose.msra.mxu0 %v881_v21 }
 0x34d   : > { %2040 = vmatprep.mubr.msk.bf16.mxu1 %vm2371_vm2, %v2370_v17  ;;  %2046 = vmatprep.mubr.msk.bf16.mxu0 %vm2371_vm2, %v2370_v17 }
 0x34e   : > { %2050 = vmatprep.subr.bf16.mxu1 %v2370_v17  ;;  %2056 = vmatprep.subr.bf16.mxu0 %v2370_v17 }
 0x353   : > { %2041 = vmatmul.mubr.msk.bf16.vlgmr.msra.gmra.mrb[8].mxu1 %vm533_vm3, %v2565_v6  ;;  %2047 = vmatmul.mubr.msk.bf16.vlgmr.msra.gmra.mrb[20].mxu0 %vm533_vm3, %v2563_v5 }
 0x354   : > { %2051 = vmatpush3.bf16.msra.mxu1 %v1043_v23  ;;  %2058 = vmatprep.mubr.msk.bf16.mxu0 %vm2371_vm2, %v2370_v17 }
 0x355   : > { %2052 = vmatprep.mubr.msk.bf16.mxu1 %vm2371_vm2, %v2370_v17  ;;  %2062 = vmatprep.subr.bf16.mxu1 %v2370_v17 }
 0x3a7   : > { %v574_v24 = vpop.f32.mrb[4].mxu0 }
 0x3a8   : > { %v923_v27 = vmul.f32 0.35355338, %v574_v24  ;;  %v2006_v29 = vpop.f32.mrb[5].mxu0 }
 0x3a9   : > { %v577_v30 = vpop.f32.mrb[6].mxu0 }
 0x3aa   : > { %v2007_v31 = vpop.f32.mrb[7].mxu0  ;;  %v2621_v32 = vadd.f32 %v931_v25, %v923_v27 }
 0x3ac   : > { %v940_v33 = vsel %vm533_vm3, %v2621_v32, -inf }
 0x3ad   : > { %941 = vmax.xlane.f32.xlu1 %v940_v33 }
 0x3af   : > { %v623_v34 = vpop.f32.mrb[8].mxu0 }
 0x3b0   : > { %v924_v35 = vmul.f32 0.35355338, %v623_v34  ;;  %v2012_v36 = vpop.f32.mrb[9].mxu0 }
 0x3b1   : > { %v626_v37 = vpop.f32.mrb[10].mxu0 }
 0x3b2   : > { %v2013_v38 = vpop.f32.mrb[11].mxu0  ;;  %v933_v39 = vadd.f32 %v931_v25, %v924_v35 }
 0x3b4   : > { %v943_v40 = vsel %vm533_vm3, %v933_v39, -inf }
 0x3b5   : > { %944 = vmax.xlane.f32.xlu0 %v943_v40 }
 0x416   : > { %v672_v41 = vpop.f32.mrb[0].mxu1  ;;  %v721_v42 = vpop.f32.mrb[12].mxu0 }
 0x417   : > { %v925_v43 = vmul.f32 0.35355338, %v672_v41  ;;  %v926_v44 = vmul.f32 0.35355338, %v721_v42  ;;  %v2018_v45 = vpop.f32.mrb[1].mxu1  ;;  %v2024_v46 = vpop.f32.mrb[13].mxu0 }
 0x418   : > { %v675_v47 = vpop.f32.mrb[2].mxu1  ;;  %v724_v48 = vpop.f32.mrb[14].mxu0 }
 0x419   : > { %v2019_v49 = vpop.f32.mrb[3].mxu1  ;;  %v2025_v51 = vpop.f32.mrb[15].mxu0  ;;  %v934_v52 = vadd.f32 %v931_v25, %v925_v43  ;;  %v935_v53 = vadd.f32 %v931_v25, %v926_v44 }
 0x41b   : > { %v946_v54 = vsel %vm533_vm3, %v934_v52, -inf  ;;  %v949_v57 = vsel %vm533_vm3, %v935_v53, -inf }
 0x41c   : > { %947 = vmax.xlane.f32.xlu0 %v946_v54 }
 0x41e   : > { %v770_v55 = vpop.f32.mrb[4].mxu1  ;;  %v819_v56 = vpop.f32.mrb[16].mxu0 }
 0x41f   : > { %v927_v60 = vmul.f32 0.35355338, %v770_v55  ;;  %v928_v63 = vmul.f32 0.35355338, %v819_v56  ;;  %v2030_v0 = vpop.f32.mrb[5].mxu1  ;;  %v2036_v1 = vpop.f32.mrb[17].mxu0 }
 0x420   : > { %v773_v4 = vpop.f32.mrb[6].mxu1  ;;  %950 = vmax.xlane.f32.xlu0 %v949_v57  ;;  %v822_v7 = vpop.f32.mrb[18].mxu0 }
 0x421   : > { %v2031_v8 = vpop.f32.mrb[7].mxu1  ;;  %v2037_v9 = vpop.f32.mrb[19].mxu0  ;;  %v936_v10 = vadd.f32 %v931_v25, %v927_v60  ;;  %v2628_v11 = vadd.f32 %v931_v25, %v928_v63 }
 0x423   : > { %v952_v12 = vsel %vm533_vm3, %v936_v10, -inf  ;;  %v955_v13 = vsel %vm533_vm3, %v2628_v11, -inf }
 0x424   : > { %953 = vmax.xlane.f32.xlu1 %v952_v12  ;;  %956 = vmax.xlane.f32.xlu0 %v955_v13 }
 0x426   : > { %v868_v14 = vpop.f32.mrb[8].mxu1  ;;  %v917_v15 = vpop.f32.mrb[20].mxu0 }
 0x427   : > { %v929_v16 = vmul.f32 0.35355338, %v868_v14  ;;  %v930_v18 = vmul.f32 0.35355338, %v917_v15  ;;  %v2042_v19 = vpop.f32.mrb[9].mxu1  ;;  %v2048_v20 = vpop.f32.mrb[21].mxu0 }
 0x428   : > { %v871_v21 = vpop.f32.mrb[10].mxu1  ;;  %v920_v22 = vpop.f32.mrb[22].mxu0 }
 0x429   : > { %v2043_v23 = vpop.f32.mrb[11].mxu1  ;;  %v2049_v24 = vpop.f32.mrb[23].mxu0  ;;  %v938_v27 = vadd.f32 %v931_v25, %v929_v16  ;;  %v2633_v29 = vadd.f32 %v931_v25, %v930_v18 }
 0x42b   : > { %v958_v30 = vsel %vm533_vm3, %v938_v27, -inf  ;;  %v961_v31 = vsel %vm533_vm3, %v2633_v29, -inf }
 0x42c   : > { %959 = vmax.xlane.f32.xlu1 %v958_v30  ;;  %962 = vmax.xlane.f32.xlu0 %v961_v31 }
 0x43a   : > { %v942_v25 = vpop.xlane.xlu1 %941 }
 0x43b   : > { %v964_v35 = vsub.f32 %v2621_v32, %v942_v25 }
 0x43d   : > { %1133 = vrot.lane.b32.xlu1 %v2552_v59, %s2376_s12  ;;  %v972_v37 = vmul.f32 1.442695, %v964_v35 }
 0x441   : > { %1181 = vrot.lane.b32.xlu1 %v2550_v58, %s2376_s12 }
 0x442   : > { %1085 = vrot.lane.b32.xlu0 %v2547_v50, %s2376_s12  ;;  %v945_v33 = vpop.xlane.xlu0 %944 }
 0x443   : > { %v965_v34 = vsub.f32 %v933_v39, %v945_v33 }
 0x445   : > { %v974_v36 = vmul.f32 1.442695, %v965_v34 }
 0x447   : > { %2237 = vpow2.f32 %v974_v36 }
 0x448   : > { %2239 = vpow2.f32 %v972_v37 }
 0x451   : > { %v2238_v38 = vpop.eup %2237 }
 0x452   : > { %v991_v40 = vsel %vm533_vm3, %v2238_v38, 0.0  ;;  %v2646_v41 = vpop.eup %2239 }
 0x453   : > { %v988_v58 = vsel %vm533_vm3, %v2646_v41, 0.0 }
 0x461   : > { %992 = vadd.xlane.f32.xlu0 %v991_v40 }
 0x465   : > { %989 = vadd.xlane.f32.xlu1 %v988_v58 }
 0x476   : > { %1229 = vrot.lane.b32.xlu1 %v2558_v62, %s2376_s12 }
 0x4a9   : > { %v948_v50 = vpop.xlane.xlu0 %947 }
 0x4aa   : > { %v966_v59 = vsub.f32 %v934_v52, %v948_v50 }
 0x4ac   : > { %v976_v32 = vmul.f32 1.442695, %v966_v59 }
 0x4ad   : > { %v951_v39 = vpop.xlane.xlu0 %950 }
 0x4ae   : > { %2241 = vpow2.f32 %v976_v32  ;;  %v967_v42 = vsub.f32 %v935_v53, %v951_v39 }
 0x4b0   : > { %v978_v43 = vmul.f32 1.442695, %v967_v42 }
 0x4b1   : > { %v954_v44 = vpop.xlane.xlu1 %953  ;;  %v957_v47 = vpop.xlane.xlu0 %956 }
 0x4b2   : > { %2243 = vpow2.f32 %v978_v43  ;;  %v968_v45 = vsub.f32 %v936_v10, %v954_v44  ;;  %v969_v4 = vsub.f32 %v2628_v11, %v957_v47 }
 0x4b4   : > { %v980_v46 = vmul.f32 1.442695, %v968_v45  ;;  %v982_v7 = vmul.f32 1.442695, %v969_v4 }
 0x4b6   : > { %2245 = vpow2.f32 %v980_v46 }
 0x4b8   : > { %v2652_v48 = vpop.eup %2241 }
 0x4b9   : > { %v960_v49 = vpop.xlane.xlu1 %959  ;;  %v963_v51 = vpop.xlane.xlu0 %962  ;;  %v994_v62 = vsel %vm533_vm3, %v2652_v48, 0.0 }
 0x4ba   : > { %v970_v54 = vsub.f32 %v938_v27, %v960_v49  ;;  %995 = vadd.xlane.f32.xlu1 %v994_v62  ;;  %v971_v8 = vsub.f32 %v2633_v29, %v963_v51 }
 0x4bc   : > { %v2656_v52 = vpop.eup %2243  ;;  %v984_v55 = vmul.f32 1.442695, %v970_v54  ;;  %v986_v9 = vmul.f32 1.442695, %v971_v8 }
 0x4bd   : > { %v1086_v53 = vpop.permute.xlu0 %1085  ;;  %v997_v56 = vsel %vm533_vm3, %v2656_v52, 0.0  ;;  %v1134_v10 = vpop.permute.xlu1 %1133 }
 0x4be   : > { %2247 = vpow2.f32 %v984_v55  ;;  %v1091_v57 = vsel %vm1041_vm4, %v1086_v53, 0  ;;  %998 = vadd.xlane.f32.xlu0 %v997_v56  ;;  %v1139_v24 = vsel %vm1041_vm4, %v1134_v10, 0 }
 0x4bf   : > { %2057 = vmatpush3.bf16.msra.mxu0 %v1091_v57  ;;  %2249 = vpow2.f32 %v982_v7 }
 0x4c0   : > { %v2661_v60 = vpop.eup %2245  ;;  %2068 = vmatprep.subr.bf16.mxu0 %v2370_v17  ;;  %2251 = vpow2.f32 %v986_v9 }
 0x4c1   : > { %v1000_v63 = vsel %vm533_vm3, %v2661_v60, 0.0  ;;  %v1182_v12 = vpop.permute.xlu1 %1181 }
 0x4c2   : > { %1001 = vadd.xlane.f32.xlu1 %v1000_v63  ;;  %v1187_v21 = vsel %vm1041_vm4, %v1182_v12, 0 }
 0x4c8   : > { %v2666_v0 = vpop.eup %2247 }
 0x4c9   : > { %v1006_v1 = vsel %vm533_vm3, %v2666_v0, 0.0  ;;  %v2676_v14 = vpop.eup %2249 }
 0x4ca   : > { %1007 = vadd.xlane.f32.xlu1 %v1006_v1  ;;  %v2680_v16 = vpop.eup %2251 }
 0x4d4   : > { %1277 = vrot.lane.b32.xlu0 %v2556_v61, %s2376_s12  ;;  %v1003_v61 = vsel %vm533_vm3, %v2676_v14, 0.0 }
 0x4db   : > { %1325 = vrot.lane.b32.xlu1 %v2565_v6, %s2376_s12  ;;  %v1009_v6 = vsel %vm533_vm3, %v2680_v16, 0.0 }
 0x4ee   : > { %v993_v13 = vpop.xlane.xlu0 %992 }
 0x4ef   : > { %2253 = vrcp.f32 %v993_v13 }
 0x4f2   : > { %v990_v15 = vpop.xlane.xlu1 %989 }
 0x4f3   : > { %2255 = vrcp.f32 %v990_v15  ;;  %1004 = vadd.xlane.f32.xlu0 %v1003_v61 }
 0x4f6   : > { %v1230_v27 = vpop.permute.xlu1 %1229 }
 0x4f7   : > { %1010 = vadd.xlane.f32.xlu0 %v1009_v6  ;;  %v1235_v36 = vsel %vm1041_vm4, %v1230_v27, 0 }
 0x4f9   : > { %v2254_v11 = vpop.eup %2253 }
 0x4fa   : > { %v1021_v18 = vmul.f32 %v2254_v11, %v2238_v38 }
 0x4fc   : > { %v1029_v19 = vpack.c.bf16 %v1021_v18, %v1021_v18 }
 0x4fd   : > { %v2256_v20 = vpop.eup %2255 }
 0x4fe   : > { %v1020_v22 = vmul.f32 %v2256_v20, %v2646_v41  ;;  %2059 = vmatmul.mubr.msk.bf16.vlgmr.msra.gmra.mrb[24].mxu0 %vm533_vm3, %v1029_v19 }
 0x4ff   : > { %2069 = vmatpush3.bf16.msra.mxu0 %v1187_v21  ;;  %2070 = vmatprep.mubr.msk.bf16.mxu0 %vm2371_vm2, %v2370_v17 }
 0x500   : > { %v1028_v23 = vpack.c.bf16 %v1020_v22, %v1020_v22  ;;  %2080 = vmatprep.subr.bf16.mxu0 %v2370_v17 }
 0x502   : > { %2053 = vmatmul.mubr.msk.bf16.vlgmr.msra.gmra.mrb[12].mxu1 %vm533_vm3, %v1028_v23  ;;  %v2221_v23 = vld [vmem:[%s2498_s30] sm:$0xff]  }
 0x503   : > { %2063 = vmatpush3.bf16.msra.mxu1 %v1139_v24  ;;  %2064 = vmatprep.mubr.msk.bf16.mxu1 %vm2371_vm2, %v2370_v17  ;;  %v2222_v24 = vld [vmem:[%s2498_s30 + $0x8] sm:$0xff]   ;;  %s1770_s30 = sshll.u32 %s2380_s16, 4  ;;  %s1771_s30 = int_to_ptr.vmem [resolvable:$true] %s1770_s30 }
 0x504   : > { %2074 = vmatprep.subr.bf16.mxu1 %v2370_v17  ;;  %s2309_s18 = scalar_lea.vmem %s1771_s30, 256  ;;  %p2316_p12 = scmp.lt.s32.totalorder %s1771_s30, %s1771_s30 }
 0x505   : > { %p2310_p8 = scmp.ne.s32.totalorder %s1771_s30, %s2309_s18  ;;  %p2317_p13 = scmp.lt.s32.totalorder %s2309_s18, %s2309_s18 }
 0x507   : > { %p2311_p10 = pnand %p2310_p8, %p2788_p6  ;;  %p2318_p0 = por %p2317_p13, %p2316_p12 }
 0x509   : > { %p2312_p11 = pneg %p2311_p10 }
 0x50b   : > { %p2319_p1 = pnand %p2318_p0, %p2312_p11 }
 0x50d   : > { %1373 = vrot.lane.b32.xlu0 %v2563_v5, %s2376_s12 }
 0x547   : > { %v996_v29 = vpop.xlane.xlu1 %995 }
 0x548   : > { %2257 = vrcp.f32 %v996_v29 }
 0x54b   : > { %v999_v30 = vpop.xlane.xlu0 %998 }
 0x54c   : > { %2259 = vrcp.f32 %v999_v30 }
 0x54f   : > { %v1002_v31 = vpop.xlane.xlu1 %1001  ;;  %v1278_v5 = vpop.permute.xlu0 %1277 }
 0x550   : > { %2261 = vrcp.f32 %v1002_v31  ;;  %v1283_v50 = vsel %vm1041_vm4, %v1278_v5, 0 }
 0x552   : > { %v2258_v33 = vpop.eup %2257 }
 0x553   : > { %v1022_v34 = vmul.f32 %v2258_v33, %v2652_v48 }
 0x555   : > { %v1030_v25 = vpack.c.bf16 %v1022_v34, %v1022_v34 }
 0x556   : > { %v2260_v35 = vpop.eup %2259 }
 0x557   : > { %v1023_v37 = vmul.f32 %v2260_v35, %v2656_v52  ;;  %2065 = vmatmul.mubr.msk.bf16.vlgmr.msra.gmra.mrb[16].mxu1 %vm533_vm3, %v1030_v25  ;;  %v1008_v38 = vpop.xlane.xlu1 %1007 }
 0x558   : > { %2075 = vmatpush3.bf16.msra.mxu1 %v1235_v36  ;;  %2263 = vrcp.f32 %v1008_v38  ;;  %2076 = vmatprep.mubr.msk.bf16.mxu1 %vm2371_vm2, %v2370_v17 }
 0x559   : > { %v1031_v40 = vpack.c.bf16 %v1023_v37, %v1023_v37  ;;  %2086 = vmatprep.subr.bf16.mxu1 %v2370_v17 }
 0x55a   : > { %v2262_v41 = vpop.eup %2261 }
 0x55b   : > { %v1024_v58 = vmul.f32 %v2262_v41, %v2661_v60  ;;  %2071 = vmatmul.mubr.msk.bf16.vlgmr.msra.gmra.mrb[28].mxu0 %vm533_vm3, %v1031_v40  ;;  %v1326_v59 = vpop.permute.xlu1 %1325 }
 0x55c   : > { %2081 = vmatpush3.bf16.msra.mxu0 %v1283_v50  ;;  %2082 = vmatprep.mubr.msk.bf16.mxu0 %vm2371_vm2, %v2370_v17  ;;  %v1331_v39 = vsel %vm1041_vm4, %v1326_v59, 0 }
 0x55d   : > { %v1032_v32 = vpack.c.bf16 %v1024_v58, %v1024_v58  ;;  %2092 = vmatprep.subr.bf16.mxu0 %v2370_v17 }
 0x55f   : > { %2077 = vmatmul.mubr.msk.bf16.vlgmr.msra.gmra.mrb[20].mxu1 %vm533_vm3, %v1032_v32 }
 0x560   : > { %2087 = vmatpush3.bf16.msra.mxu1 %v1331_v39  ;;  %2088 = vmatprep.mubr.msk.bf16.mxu1 %vm2371_vm2, %v2370_v17 }
 0x561   : > { %2098 = vmatprep.subr.bf16.mxu1 %v2370_v17 }
 0x562   : > { %v2264_v42 = vpop.eup %2263 }
 0x563   : > { %v1026_v43 = vmul.f32 %v2264_v42, %v2666_v0 }
 0x565   : > { %v1034_v44 = vpack.c.bf16 %v1026_v43, %v1026_v43 }
 0x567   : > { %2089 = vmatmul.mubr.msk.bf16.vlgmr.msra.gmra.mrb[24].mxu1 %vm533_vm3, %v1034_v44 }
 0x568   : > { %2102 = vmatprep.mubr.msk.bf16.mxu1 %vm2371_vm2, %v2370_v17  ;;  %2099 = vmatpush3.bf16.msra.mxu1 %v2221_v23 }
 0x569   : > { %2100 = vmatprep.subr.bf16.mxu1 %v2370_v17 }
 0x56c   : > { %2101 = vmatpush3.bf16.msra.mxu1 %v2222_v24 }
 0x56d   : > { %2114 = vmatprep.subr.bf16.mxu1 %v2370_v17 }
 0x580   : > { %v1005_v45 = vpop.xlane.xlu0 %1004 }
 0x581   : > { %2265 = vrcp.f32 %v1005_v45 }
 0x584   : > { %v1011_v46 = vpop.xlane.xlu0 %1010 }
 0x585   : > { %2267 = vrcp.f32 %v1011_v46 }
 0x588   : > { %v1374_v49 = vpop.permute.xlu0 %1373 }
 0x589   : > { %v1379_v54 = vsel %vm1041_vm4, %v1374_v49, 0  ;;  %v1518_v49 = vsub.s32 3, %v2533_v26 }
 0x58b   : > { %v2266_v47 = vpop.eup %2265 }
 0x58c   : > { %v1025_v48 = vmul.f32 %v2266_v47, %v2676_v14 }
 0x58e   : > { %v1033_v51 = vpack.c.bf16 %v1025_v48, %v1025_v48 }
 0x58f   : > { %v2268_v62 = vpop.eup %2267 }
 0x590   : > { %2083 = vmatmul.mubr.msk.bf16.vlgmr.msra.gmra.mrb[32].mxu0 %vm533_vm3, %v1033_v51  ;;  %v1027_v52 = vmul.f32 %v2268_v62, %v2680_v16  ;;  %v1519_v51 = vrot.slane %v2537_v28, %v1518_v49 }
 0x591   : > { %2093 = vmatpush3.bf16.msra.mxu0 %v1379_v54  ;;  %2094 = vmatprep.mubr.msk.bf16.mxu0 %vm2371_vm2, %v2370_v17 }
 0x592   : > { %2106 = vmatprep.subr.bf16.mxu0 %v2370_v17  ;;  %v1035_v55 = vpack.c.bf16 %v1027_v52, %v1027_v52 }
 0x598   : > { %2095 = vmatmul.mubr.msk.bf16.vlgmr.msra.gmra.mrb[36].mxu0 %vm533_vm3, %v1035_v55 }
 0x599   : > { %2110 = vmatprep.mubr.msk.bf16.mxu0 %vm2371_vm2, %v2370_v17 }
 0x5d1   : > { %v1127_v53 = vpop.f32.mrb[24].mxu0 }
 0x5d2   : > { %v2060_v56 = vpop.f32.mrb[25].mxu0 }
 0x5d3   : > { %v1130_v57 = vpop.f32.mrb[26].mxu0 }
 0x5d4   : > { %v2061_v60 = vpop.f32.mrb[27].mxu0 }
 0x5d5   : > { %v1079_v63 = vpop.f32.mrb[12].mxu1 }
 0x5d6   : > { %v2054_v0 = vpop.f32.mrb[13].mxu1 }
 0x5d7   : > { %v1082_v1 = vpop.f32.mrb[14].mxu1 }
 0x5d8   : > { %v2055_v4 = vpop.f32.mrb[15].mxu1 }
 0x62a   : > { %v1175_v7 = vpop.f32.mrb[16].mxu1 }
 0x62b   : > { %v2066_v8 = vpop.f32.mrb[17].mxu1 }
 0x62c   : > { %v1178_v9 = vpop.f32.mrb[18].mxu1 }
 0x62d   : > { %v2067_v10 = vpop.f32.mrb[19].mxu1 }
 0x62e   : > { %v1223_v12 = vpop.f32.mrb[28].mxu0 }
 0x62f   : > { %v2204_v13 = vpack.i.bf16 %v1223_v12, %v1175_v7  ;;  %v2072_v14 = vpop.f32.mrb[29].mxu0 }
 0x630   : > { %v1226_v15 = vpop.f32.mrb[30].mxu0 }
 0x631   : > { %2205 = vrot.lane.b32.xlu1 %v2204_v13, %s2377_s29  ;;  %v2073_v61 = vpop.f32.mrb[31].mxu0 }
 0x632   : > { %v1271_v16 = vpop.f32.mrb[20].mxu1  ;;  %v2223_v61 = vld [vmem:[%s2503_s19] sm:$0xff]  }
 0x633   : > { %v2078_v6 = vpop.f32.mrb[21].mxu1  ;;  %2107 = vmatpush3.bf16.msra.mxu0 %v2223_v61 }
 0x634   : > { %v1274_v11 = vpop.f32.mrb[22].mxu1  ;;  %2108 = vmatprep.subr.bf16.mxu0 %v2370_v17 }
 0x635   : > { %v2079_v18 = vpop.f32.mrb[23].mxu1 }
 0x63a   : > { %v1367_v19 = vpop.f32.mrb[24].mxu1 }
 0x63b   : > { %v2090_v20 = vpop.f32.mrb[25].mxu1 }
 0x63c   : > { %v1370_v21 = vpop.f32.mrb[26].mxu1 }
 0x63d   : > { %v2091_v22 = vpop.f32.mrb[27].mxu1 }
 0x63e   : > { %v1554_v22 = vsub.s32 4, %v2533_v26 }
 0x640   : > { %v1555_v24 = vrot.slane %v2537_v28, %v1554_v22 }
 0x663   : > { %v1319_v27 = vpop.f32.mrb[32].mxu0 }
 0x664   : > { %v2209_v29 = vpack.i.bf16 %v1319_v27, %v1271_v16  ;;  %v2084_v30 = vpop.f32.mrb[33].mxu0  ;;  %v2224_v16 = vld [vmem:[%s2503_s19 + $0x8] sm:$0xff]  }
 0x665   : > { %v1322_v31 = vpop.f32.mrb[34].mxu0  ;;  %2109 = vmatpush3.bf16.msra.mxu0 %v2224_v16 }
 0x666   : > { %2210 = vrot.lane.b32.xlu0 %v2209_v29, %s2378_s14  ;;  %v2085_v33 = vpop.f32.mrb[35].mxu0  ;;  %v1560_v29 = vsub.s32 5, %v2533_v26 }
 0x66b   : > { %v1415_v34 = vpop.f32.mrb[36].mxu0 }
 0x66c   : > { %v2214_v25 = vpack.i.bf16 %v1415_v34, %v1367_v19  ;;  %v2096_v35 = vpop.f32.mrb[37].mxu0  ;;  %v1561_v34 = vrot.slane %v2537_v28, %v1560_v29 }
 0x66d   : > { %v1418_v36 = vpop.f32.mrb[38].mxu0 }
 0x66e   : > { %2215 = vrot.lane.b32.xlu1 %v2214_v25, %s2379_s15  ;;  %v2097_v37 = vpop.f32.mrb[39].mxu0 }
 0x6a3   : > { %v2206_v38 = vpop.permute.xlu1 %2205 }
 0x6a4   : > { %v2208_v40 = vunpack.i.h.bf16 %v2206_v38  ;;  %v2207_v41 = vunpack.i.l.bf16 %v2206_v38  ;;  %v2225_v38 = vld [vmem:[%s2508_s8] sm:$0xff]  }
 0x6a6   : > { %v1446_v32 = vsel %vm533_vm3, %v1127_v53, %v2208_v40  ;;  %v1445_v39 = vsel %vm533_vm3, %v1079_v63, %v2207_v41  ;;  %v2227_v40 = vld [vmem:[%s2508_s8 + $0x10] sm:$0xff]   ;;  %v2228_v41 = vld [vmem:[%s2508_s8 + $0x18] sm:$0xff]  }
 0x6d8   : > { %v2211_v5 = vpop.permute.xlu0 %2210 }
 0x6d9   : > { %v2213_v58 = vunpack.i.h.bf16 %v2211_v5  ;;  %v2212_v50 = vunpack.i.l.bf16 %v2211_v5  ;;  %v2226_v5 = vld [vmem:[%s2508_s8 + $0x8] sm:$0xff]  }
 0x6db   : > { %v1449_v44 = vsel %vm1447_vm5, %v1446_v32, %v2213_v58  ;;  %v1448_v45 = vsel %vm1447_vm5, %v1445_v39, %v2212_v50  ;;  %v2229_v58 = vld [vmem:[%s2508_s8 + $0x20] sm:$0xff]   ;;  %v2230_v50 = vld [vmem:[%s2508_s8 + $0x28] sm:$0xff]   ;;  %v2232_v32 = vld [vmem:[%s2508_s8 + $0x38] sm:$0xff]   ;;  %v1571_v39 = vsub.s32 6, %v2533_v26 }
 0x6e0   : > { %v2216_v59 = vpop.permute.xlu1 %2215 }
 0x6e1   : > { %v2218_v42 = vunpack.i.h.bf16 %v2216_v59  ;;  %v2217_v43 = vunpack.i.l.bf16 %v2216_v59  ;;  %v2231_v59 = vld [vmem:[%s2508_s8 + $0x30] sm:$0xff]  }
 0x6e3   : > { %v1452_v46 = vsel %vm1450_vm6, %v1449_v44, %v2218_v42  ;;  %v1451_v47 = vsel %vm1450_vm6, %v1448_v45, %v2217_v43  ;;  %v1572_v42 = vrot.slane %v2537_v28, %v1571_v39 }
 0x6e4   : > { %v1457_v48 = vpack.c.bf16 %v1452_v46, %v1451_v47 }
 0x6e6   : > { %2103 = vmatmul.mubr.msk.bf16.vlgmr.msra.gmra.mrb[28].mxu1 %vm397_vm1, %v1457_v48 }
 0x6e7   : > { %2130 = vmatprep.mubr.msk.bf16.mxu1 %vm2371_vm2, %v2370_v17  ;;  %2115 = vmatpush3.bf16.msra.mxu1 %v2225_v38 }
 0x6e8   : > { %2116 = vmatprep.subr.bf16.mxu1 %v2370_v17 }
 0x6eb   : > { %2117 = vmatpush3.bf16.msra.mxu1 %v2226_v5 }
 0x6ec   : > { %2118 = vmatprep.subr.bf16.mxu1 %v2370_v17 }
 0x6ef   : > { %2119 = vmatpush3.bf16.msra.mxu1 %v2227_v40 }
 0x6f0   : > { %2120 = vmatprep.subr.bf16.mxu1 %v2370_v17 }
 0x6f3   : > { %2121 = vmatpush3.bf16.msra.mxu1 %v2228_v41 }
 0x6f4   : > { %2122 = vmatprep.subr.bf16.mxu1 %v2370_v17 }
 0x6f7   : > { %2123 = vmatpush3.bf16.msra.mxu1 %v2229_v58 }
 0x6f8   : > { %2124 = vmatprep.subr.bf16.mxu1 %v2370_v17 }
 0x6fb   : > { %2125 = vmatpush3.bf16.msra.mxu1 %v2230_v50 }
 0x6fc   : > { %2126 = vmatprep.subr.bf16.mxu1 %v2370_v17 }
 0x6ff   : > { %2127 = vmatpush3.bf16.msra.mxu1 %v2231_v59 }
 0x700   : > { %2128 = vmatprep.subr.bf16.mxu1 %v2370_v17 }
 0x703   : > { %2129 = vmatpush3.bf16.msra.mxu1 %v2232_v32 }
 0x7b9   : > { %v1507_v62 = vpop.f32.mrb[28].mxu1 }
 0x7ba   : > { %v1514_v54 = vadd.f32 %v1507_v62, %v2511_v2  ;;  %v2104_v52 = vpop.f32.mrb[29].mxu1 }
 0x7bb   : > { %v1510_v55 = vpop.f32.mrb[30].mxu1 }
 0x7bc   : > { %v1520_v53 = vadd.f32 %v1519_v51, %v1514_v54  ;;  %v1515_v56 = vadd.f32 %v1510_v55, %v2513_v3  ;;  %v2105_v57 = vpop.f32.mrb[31].mxu1 }
 0x7be   : > { %1522 = vst.msk [vmem:[#allocation5] sm:$0xff] %vm397_vm1, %v1520_v53  ;;  %v1521_v60 = vadd.f32 %v1519_v51, %v1515_v56 }
 0x7c0   : > { %1523 = vst.msk [vmem:[#allocation5 + $0x8] sm:$0xff] %vm397_vm1, %v1521_v60 }
 0x7c5   : > { %v2745_v63 = vld [vmem:[#allocation5] sm:$0xff] }
 0x7c6   : > { %v1526_v0 = vsel %vm397_vm1, %v2745_v63, 0.0 }
 0x7c7   : > { %1527 = vadd.xlane.f32.xlu0 %v1526_v0  ;;  %v2749_v1 = vld [vmem:[#allocation5 + $0x8] sm:$0xff] }
 0x7c8   : > { %v1529_v2 = vsel %vm397_vm1, %v2749_v1, 0.0 }
 0x7c9   : > { %1530 = vadd.xlane.f32.xlu1 %v1529_v2 }
 0x854   : > { %v1528_v3 = vpop.xlane.xlu0 %1527 }
 0x855   : > { %v1532_v4 = vmul.f32 0.03125, %v1528_v3  ;;  %v1755_v3 = vsub.s32 7, %v2533_v26 }
 0x856   : > { %v1531_v7 = vpop.xlane.xlu1 %1530 }
 0x857   : > { %v1534_v8 = vsub.f32 %v2745_v63, %v1532_v4  ;;  %v1533_v9 = vmul.f32 0.03125, %v1531_v7  ;;  %v1756_v4 = vrot.slane %v2537_v28, %v1755_v3 }
 0x859   : > { %v1535_v10 = vsub.f32 %v2749_v1, %v1533_v9  ;;  %v1536_v12 = vmul.f32 %v1534_v8, %v1534_v8 }
 0x85b   : > { %v1538_v13 = vsel %vm397_vm1, %v1536_v12, 0.0  ;;  %v1537_v14 = vmul.f32 %v1535_v10, %v1535_v10 }
 0x85c   : > { %1539 = vadd.xlane.f32.xlu0 %v1538_v13 }
 0x85d   : > { %v1541_v15 = vsel %vm397_vm1, %v1537_v14, 0.0 }
 0x860   : > { %1542 = vadd.xlane.f32.xlu0 %v1541_v15 }
 0x8e9   : > { %v1540_v6 = vpop.xlane.xlu0 %1539 }
 0x8ea   : > { %v1544_v11 = vmul.f32 0.03125, %v1540_v6 }
 0x8ec   : > { %v1546_v18 = vadd.f32 1e-05, %v1544_v11 }
 0x8ed   : > { %v1543_v19 = vpop.xlane.xlu0 %1542 }
 0x8ee   : > { %2269 = vrsqrt.f32 %v1546_v18  ;;  %v1545_v20 = vmul.f32 0.03125, %v1543_v19 }
 0x8f0   : > { %v1547_v21 = vadd.f32 1e-05, %v1545_v20 }
 0x8f2   : > { %2271 = vrsqrt.f32 %v1547_v21 }
 0x8f8   : > { %v2270_v23 = vpop.eup %2269 }
 0x8f9   : > { %v1550_v27 = vmul.f32 %v2270_v23, %v1534_v8 }
 0x8fb   : > { %v1556_v31 = vmul.f32 %v1555_v24, %v1550_v27 }
 0x8fc   : > { %v2272_v30 = vpop.eup %2271 }
 0x8fd   : > { %v1551_v33 = vmul.f32 %v2272_v30, %v1535_v10  ;;  %v1562_v35 = vadd.f32 %v1561_v34, %v1556_v31 }
 0x8ff   : > { %v1557_v25 = vmul.f32 %v1555_v24, %v1551_v33 }
 0x901   : > { %v1563_v36 = vadd.f32 %v1561_v34, %v1557_v25 }
 0x903   : > { %v1568_v37 = vpack.c.bf16 %v1563_v36, %v1562_v35 }
 0x905   : > { %2111 = vmatmul.mubr.msk.bf16.vlgmr.msra.gmra.mrb[40].mxu0 %vm397_vm1, %v1568_v37 }
 0x9d8   : > { %v1622_v43 = vpop.f32.mrb[40].mxu0 }
 0x9d9   : > { %v1623_v44 = vadd.f32 %v1622_v43, %v1572_v42  ;;  %v2112_v45 = vpop.f32.mrb[41].mxu0 }
 0x9da   : > { %v1625_v46 = vpop.f32.mrb[42].mxu0 }
 0x9db   : > { %v1926_v47 = vmul.f32 -1.702, %v1623_v44  ;;  %v1626_v48 = vadd.f32 %v1625_v46, %v1572_v42  ;;  %v2113_v49 = vpop.f32.mrb[43].mxu0 }
 0x9dd   : > { %v1633_v51 = vmul.f32 1.442695, %v1926_v47  ;;  %v1927_v62 = vmul.f32 -1.702, %v1626_v48 }
 0x9df   : > { %2273 = vpow2.f32 %v1633_v51  ;;  %v1635_v54 = vmul.f32 1.442695, %v1927_v62 }
 0x9e1   : > { %2275 = vpow2.f32 %v1635_v54 }
 0x9e9   : > { %v2274_v52 = vpop.eup %2273 }
 0x9ea   : > { %v1637_v17 = vadd.f32 1.0, %v2274_v52 }
 0x9eb   : > { %v2276_v55 = vpop.eup %2275 }
 0x9ec   : > { %2277 = vrcp.f32 %v1637_v17  ;;  %v1638_v53 = vadd.f32 1.0, %v2276_v55 }
 0x9ee   : > { %2279 = vrcp.f32 %v1638_v53 }
 0x9f6   : > { %v2278_v56 = vpop.eup %2277 }
 0x9f7   : > { %v1643_v60 = vmul.f32 %v2278_v56, %v1623_v44 }
 0x9f8   : > { %v2280_v57 = vpop.eup %2279 }
 0x9f9   : > { %v1644_v0 = vmul.f32 %v2280_v57, %v1626_v48 }
 0x9fb   : > { %v1661_v2 = vpack.c.bf16 %v1644_v0, %v1643_v60 }
 0x9fd   : > { %2131 = vmatmul.mubr.bf16.vlgmr.msra.gmra.mrb[32].mxu1 %v1661_v2 }
 0xad0   : > { %v1744_v7 = vpop.f32.mrb[32].mxu1 }
 0xad1   : > { %v1751_v8 = vadd.f32 %v1744_v7, %v2745_v63  ;;  %v2132_v9 = vpop.f32.mrb[33].mxu1 }
 0xad2   : > { %v1747_v10 = vpop.f32.mrb[34].mxu1 }
 0xad3   : > { %v1757_v12 = vadd.f32 %v1756_v4, %v1751_v8  ;;  %v1752_v13 = vadd.f32 %v1747_v10, %v2749_v1  ;;  %v2133_v14 = vpop.f32.mrb[35].mxu1 }
 0xad5   : > { %1759 = vst.msk [vmem:[#allocation5] sm:$0xff] %vm397_vm1, %v1757_v12  ;;  %v1758_v26 = vadd.f32 %v1756_v4, %v1752_v13 }
 0xad7   : > { %1760 = vst.msk [vmem:[#allocation5 + $0x8] sm:$0xff] %vm397_vm1, %v1758_v26 }
 0xad8   : > { %2322 = shalt.err (!%p2319_p1)
}
 0xad9   : > { %s2323_s20 = scalar_lea.hbm %s2833_s7, 256 }
 0xada   : > { %p2324_p2 = scmp.ne.s32.totalorder %s2833_s7, %s2323_s20  ;;  %p2329_p9 = scmp.lt.u32.totalorder %s2323_s20, %s2833_s7 }
 0xadc   : > { %p2325_p5 = pnand %p2324_p2, %p2788_p6 }
 0xade   : > { %p2326_p7 = pneg %p2325_p5 }
 0xae0   : > { %p2331_p3 = pnand %p2329_p9, %p2326_p7 }
 0xae2   : > { %2334 = shalt.err (!%p2331_p3)
}
 0xae3   : > { %s2381_s23 = smov 128  }
 0xae4   : > { %2139 = dma.vmem_to_hbm [thread:$0]  (%p2788_p6), %s1771_s30, 256, %s2833_s7, [#allocation4], %s2381_s23, %s2381_s23, %s2377_s29  }
 0xae5   : > { %2352 = dma.done.wait (%p2788_p6), [#allocation4], 256  }
 0xae6   : > { %2354 = vsyncadd (%p2788_p6), [#allocation4], 4294967040 }
 0xae7 PF: > { %s19_s26 = sadd.s32 1, %s2365_s26   ;;  %s2843_s24 = smov %s2361_s25 }
 0xae8   : > { %p16_p4 = scmp.ge.s32.totalorder %s19_s26, 4   ;;  %s2844_s25 = smov %s2846_s28 }
 0xaea   :  { %18 = sbr.rel (!%p16_p4) target bundleno = 3 (0x3), region = 98 }
 0xaf1   :  { %1786 = vsyncpa [#allocation3], 1 }
 0xaf2   :  { %1788 = vsyncpa [#allocation3 + $0x1], 1 }
 0xaf3   :  { %1789 = vsyncpa [#allocation4], 1 }
 0xaf4   :  { %1791 = vsyncpa [#allocation4 + $0x1], 1 }

</bundles_post_ra>
